<compile_context>
chip_gen: v7x
topology: tpu7x:2x2x1
jax: 0.10.0
libtpu: 0.0.40
codegen_flags: <defaults>
</compile_context>

<pallas_src>
import jax
import jax.numpy as jnp
from jax.experimental import pallas as pl
from jax.experimental.pallas import tpu as pltpu

# ---------------------------------------------------------------------------
# Model sizes (SAGEConv(input_size, 256) + residual  =>  input_size must be 256)
# ---------------------------------------------------------------------------
IN_SIZE = 256            # node feature size (must equal 256 for the residual add)
H1 = 256                 # SAGEConv output
H2 = 128                 # lin1 output
H3 = 32                  # lin2 output
OUT_SIZE = 8             # lin3 output (value-head size)
OUT_PAD = 128            # lane-dense padded output width

N_NODES = 8              # nodes per graph (small demo graph)
GRAPHS_PER_BLOCK = 32    # graphs packed per grid step
BN = GRAPHS_PER_BLOCK * N_NODES   # 256 node-rows per block => matmul M/K = 256 (MXU tile)


def gnn_critic_kernel(adj_ref, x_ref, wl_ref, wr_ref, bl_ref,
                      w1_ref, b1_ref, w2_ref, b2_ref, w3_ref, b3_ref,
                      out_ref):
    """Forward pass for one block of GRAPHS_PER_BLOCK graphs, fully VMEM resident."""
    x = x_ref[...]                                                     # [BN, 256] bf16

    # SAGEConv mean aggregation: resident block-diagonal row-normalized adjacency
    # (K = BN = 256, matches the 256x256 MXU tile).
    agg = jnp.dot(adj_ref[...], x, preferred_element_type=jnp.float32)  # [BN, 256] f32

    # SAGEConv = lin_l(agg) + lin_r(x) + bias: two accumulating dots, no scratch round-trip.
    sage = (jnp.dot(agg.astype(jnp.bfloat16), wl_ref[...],
                    preferred_element_type=jnp.float32)
            + jnp.dot(x, wr_ref[...], preferred_element_type=jnp.float32)
            + bl_ref[...])                                             # [BN, 256] f32

    # relu + residual (requires IN_SIZE == H1 == 256).
    h = jnp.maximum(sage, 0.0) + x.astype(jnp.float32)                 # [BN, 256] f32

    # Per-graph node sum (torch.sum(x, dim=0)): tile-aligned reshape (8 f32 sublanes per
    # graph -> free view) + sublane reduce on the VPU/XLU, off the MXU critical path.
    s = jnp.sum(h.reshape(GRAPHS_PER_BLOCK, N_NODES, H1), axis=1)      # [GB, 256] f32

    # MLP head: 256 -> 128 -> 32 -> OUT (lane-padded to 128).
    y = jnp.maximum(jnp.dot(s.astype(jnp.bfloat16), w1_ref[...],
                            preferred_element_type=jnp.float32) + b1_ref[...], 0.0)
    y = jnp.maximum(jnp.dot(y.astype(jnp.bfloat16), w2_ref[...],
                            preferred_element_type=jnp.float32) + b2_ref[...], 0.0)
    out = jnp.dot(y.astype(jnp.bfloat16), w3_ref[...],
                  preferred_element_type=jnp.float32) + b3_ref[...]    # [GB, 128] f32
    out_ref[...] = out.astype(out_ref.dtype)                           # bf16 store


def _const_spec(shape):
    """Grid-resident operand: same block every grid step (fetched once)."""
    return pl.BlockSpec(shape, lambda g: (0,) * len(shape))


def build_mean_adjacency(edge_index, n):
    """Row-normalized mean-aggregation matrix: A[i,j] = 1/deg_in(i) if edge j->i."""
    src, dst = edge_index[0], edge_index[1]
    adj = jnp.zeros((n, n), jnp.float32).at[dst, src].add(1.0)
    deg = jnp.sum(adj, axis=1, keepdims=True)
    return jnp.where(deg > 0.0, adj / jnp.maximum(deg, 1.0), 0.0)


def gnn_critic_forward(x_all, adj_graph, params):
    """x_all: [B, N, 256] f32 node features; adj_graph: [N, N] f32 shared mean-adjacency.

    Returns [B, OUT_SIZE] critic values (one vector per graph).
    """
    B, N, F = x_all.shape
    assert F == IN_SIZE and N == N_NODES
    assert B % GRAPHS_PER_BLOCK == 0, "pad the batch to a multiple of GRAPHS_PER_BLOCK"
    num_blocks = B // GRAPHS_PER_BLOCK

    wl, wr, bl, w1, b1, w2, b2, w3p, b3p = params

    # --- wrapper glue (static graph structure -> built once, grid-resident) ----------
    # Block-diagonal aggregation matrix kron(I_GB, A): [BN, BN], shared by every block.
    # TODO(synk): per-graph dynamic adjacency would need a streamed compact [GB, N, N]
    #             operand expanded in-kernel instead of this resident constant.
    adj_bd = jnp.kron(jnp.eye(GRAPHS_PER_BLOCK, dtype=jnp.float32),
                      adj_graph).astype(jnp.bfloat16)                  # [256, 256]

    x_flat = x_all.reshape(B * N, F).astype(jnp.bfloat16)              # [num_blocks*BN, 256]
    # ----------------------------------------------------------------------------------

    operands = (adj_bd, x_flat, wl, wr, bl, w1, b1, w2, b2, w3p, b3p)

    in_specs = [
        _const_spec(adj_bd.shape),                          # adjacency: grid-resident
        pl.BlockSpec((BN, IN_SIZE), lambda g: (g, 0)),      # node features: streams per block
        _const_spec(wl.shape),                              # weights/biases: grid-resident
        _const_spec(wr.shape),
        _const_spec(bl.shape),
        _const_spec(w1.shape),
        _const_spec(b1.shape),
        _const_spec(w2.shape),
        _const_spec(b2.shape),
        _const_spec(w3p.shape),
        _const_spec(b3p.shape),
    ]
    out_spec = pl.BlockSpec((GRAPHS_PER_BLOCK, OUT_PAD), lambda g: (g, 0))

    flops_per_block = (
        2 * BN * BN * IN_SIZE                                # aggregation matmul
        + 2 * (2 * BN * IN_SIZE * H1)                        # two SAGE matmuls
        + 2 * GRAPHS_PER_BLOCK * (H1 * H2 + H2 * H3 + H3 * OUT_PAD)  # MLP head
    )
    resident_bytes = int(sum(op.size * op.dtype.itemsize for op in operands[:1] + operands[2:]))
    streamed_bytes = int(x_flat.size * x_flat.dtype.itemsize + B * OUT_PAD * 2)
    cost = pl.CostEstimate(flops=int(num_blocks * flops_per_block),
                           transcendentals=0,
                           bytes_accessed=resident_bytes + streamed_bytes)

    out = pl.pallas_call(
        gnn_critic_kernel,
        out_shape=jax.ShapeDtypeStruct((B, OUT_PAD), jnp.bfloat16),
        grid_spec=pltpu.PrefetchScalarGridSpec(
            num_scalar_prefetch=0,
            grid=(num_blocks,),
            in_specs=in_specs,
            out_specs=out_spec,
        ),
        compiler_params=pltpu.CompilerParams(
            dimension_semantics=("parallel",)),   # shards blocks across v7x's 2 TCs
        cost_estimate=cost,
    )(*operands)

    return out[:, :OUT_SIZE].astype(jnp.float32)              # [B, OUT_SIZE]


def init_params(key):
    """Deterministic synthetic weights matching the module's shapes.

    Weights stored as [in, out] (W_torch.T) so the kernel computes x @ W.
    Large matrices are bf16 (MXU-native); biases stay f32.
    """
    ks = jax.random.split(key, 9)
    scale = 0.05
    wl = (scale * jax.random.normal(ks[0], (IN_SIZE, H1), jnp.float32)).astype(jnp.bfloat16)
    wr = (scale * jax.random.normal(ks[1], (IN_SIZE, H1), jnp.float32)).astype(jnp.bfloat16)
    bl = scale * jax.random.normal(ks[2], (1, H1), jnp.float32)
    w1 = (scale * jax.random.normal(ks[3], (H1, H2), jnp.float32)).astype(jnp.bfloat16)
    b1 = scale * jax.random.normal(ks[4], (1, H2), jnp.float32)
    w2 = (scale * jax.random.normal(ks[5], (H2, H3), jnp.float32)).astype(jnp.bfloat16)
    b2 = scale * jax.random.normal(ks[6], (1, H3), jnp.float32)
    w3 = scale * jax.random.normal(ks[7], (H3, OUT_SIZE), jnp.float32)
    b3 = scale * jax.random.normal(ks[8], (1, OUT_SIZE), jnp.float32)
    w3p = jnp.zeros((H3, OUT_PAD), jnp.float32).at[:, :OUT_SIZE].set(w3).astype(jnp.bfloat16)
    b3p = jnp.zeros((1, OUT_PAD), jnp.float32).at[:, :OUT_SIZE].set(b3)
    return (wl, wr, bl, w1, b1, w2, b2, w3p, b3p)


def reference_forward(x_all, adj_graph, params):
    """Pure-JAX reference with the same bf16 casting points as the kernel."""
    wl, wr, bl, w1, b1, w2, b2, w3p, b3p = params
    f32, bf16 = jnp.float32, jnp.bfloat16
    xb = x_all.astype(bf16).astype(f32)                                  # [B,N,256]
    adj = adj_graph.astype(bf16).astype(f32)                             # [N,N]
    agg = jnp.einsum('ij,bjf->bif', adj, xb)                             # [B,N,256]
    sage = (agg.astype(bf16).astype(f32) @ wl.astype(f32)
            + xb @ wr.astype(f32) + bl)
    h = jnp.maximum(sage, 0.0) + xb
    s = jnp.sum(h, axis=1)                                               # [B,256]
    y = jnp.maximum(s.astype(bf16).astype(f32) @ w1.astype(f32) + b1, 0.0)
    y = jnp.maximum(y.astype(bf16).astype(f32) @ w2.astype(f32) + b2, 0.0)
    out = y.astype(bf16).astype(f32) @ w3p.astype(f32) + b3p
    return out[:, :OUT_SIZE].astype(bf16).astype(f32)


if __name__ == "__main__":
    key = jax.random.PRNGKey(0)
    k_x, k_p = jax.random.split(key)

    num_blocks = 4                                         # even -> both v7x TCs get 2 steps
    B = num_blocks * GRAPHS_PER_BLOCK                      # 128 graphs, 8 nodes each

    x_all = jax.random.normal(k_x, (B, N_NODES, IN_SIZE), jnp.float32)

    # Small deterministic graph: ring + a couple of extra edges (directed j -> i),
    # shared by every graph in the batch (static structure -> resident adjacency).
    src = jnp.array([0, 1, 2, 3, 4, 5, 6, 7, 0, 3], dtype=jnp.int32)
    dst = jnp.array([1, 2, 3, 4, 5, 6, 7, 0, 4, 7], dtype=jnp.int32)
    edge_index = jnp.stack([src, dst], axis=0)
    adj_g = build_mean_adjacency(edge_index, N_NODES)      # [N, N]

    params = init_params(k_p)

    out = gnn_critic_forward(x_all, adj_g, params)
    jax.block_until_ready(out)

    ref = reference_forward(x_all, adj_g, params)
    assert out.shape == (B, OUT_SIZE)
    assert jnp.allclose(out, ref, rtol=1e-2, atol=1e-2), (out, ref)

    print("KERNEL_OK")
</pallas_src>

<mosaic_0001>
module attributes {stable_mosaic.version = 11 : i64} {
  func.func @gnn_critic_kernel(%arg0: i32, %arg1: memref<256x256xbf16, #tpu.memory_space<vmem>>, %arg2: memref<256x256xbf16, #tpu.memory_space<vmem>>, %arg3: memref<256x256xbf16, #tpu.memory_space<vmem>>, %arg4: memref<256x256xbf16, #tpu.memory_space<vmem>>, %arg5: memref<1x256xf32, #tpu.memory_space<vmem>>, %arg6: memref<256x128xbf16, #tpu.memory_space<vmem>>, %arg7: memref<1x128xf32, #tpu.memory_space<vmem>>, %arg8: memref<128x32xbf16, #tpu.memory_space<vmem>>, %arg9: memref<1x32xf32, #tpu.memory_space<vmem>>, %arg10: memref<32x128xbf16, #tpu.memory_space<vmem>>, %arg11: memref<1x128xf32, #tpu.memory_space<vmem>>, %arg12: memref<32x128xbf16, #tpu.memory_space<vmem>>) attributes {dimension_semantics = [#tpu.dimension_semantics<parallel>], iteration_bounds = array<i64: 4>, scalar_prefetch = 0 : i64, scratch_operands = 0 : i64, tpu.core_type = #tpu.core_type<tc>, window_params = [{pipeline_mode = #tpu.pipeline_mode<synchronous>, transform_indices = @transform_0, window_bounds = array<i64: 256, 256>}, {transform_indices = @transform_1, window_bounds = array<i64: 256, 256>}, {pipeline_mode = #tpu.pipeline_mode<synchronous>, transform_indices = @transform_2, window_bounds = array<i64: 256, 256>}, {pipeline_mode = #tpu.pipeline_mode<synchronous>, transform_indices = @transform_3, window_bounds = array<i64: 256, 256>}, {pipeline_mode = #tpu.pipeline_mode<synchronous>, transform_indices = @transform_4, window_bounds = array<i64: 1, 256>}, {pipeline_mode = #tpu.pipeline_mode<synchronous>, transform_indices = @transform_5, window_bounds = array<i64: 256, 128>}, {pipeline_mode = #tpu.pipeline_mode<synchronous>, transform_indices = @transform_6, window_bounds = array<i64: 1, 128>}, {pipeline_mode = #tpu.pipeline_mode<synchronous>, transform_indices = @transform_7, window_bounds = array<i64: 128, 32>}, {pipeline_mode = #tpu.pipeline_mode<synchronous>, transform_indices = @transform_8, window_bounds = array<i64: 1, 32>}, {pipeline_mode = #tpu.pipeline_mode<synchronous>, transform_indices = @transform_9, window_bounds = array<i64: 32, 128>}, {pipeline_mode = #tpu.pipeline_mode<synchronous>, transform_indices = @transform_10, window_bounds = array<i64: 1, 128>}, {transform_indices = @transform_11, window_bounds = array<i64: 32, 128>}]} {
    %c0 = arith.constant 0 : index
    %c0_0 = arith.constant 0 : index
    %0 = vector.load %arg2[%c0, %c0_0] : memref<256x256xbf16, #tpu.memory_space<vmem>>, vector<256x256xbf16>
    %c0_1 = arith.constant 0 : index
    %c0_2 = arith.constant 0 : index
    %1 = vector.load %arg1[%c0_1, %c0_2] : memref<256x256xbf16, #tpu.memory_space<vmem>>, vector<256x256xbf16>
    %cst = arith.constant dense<0.000000e+00> : vector<256x256xf32>
    %2 = tpu.matmul %1, %0, %cst {dimension_numbers = #tpu.dot_dimension_numbers<[1], [0], [0], [1], [0, 0, 1, 1], [], []>} : vector<256x256xbf16>, vector<256x256xbf16>, vector<256x256xf32> -> vector<256x256xf32>
    %3 = arith.truncf %2 : vector<256x256xf32> to vector<256x256xbf16>
    %c0_3 = arith.constant 0 : index
    %c0_4 = arith.constant 0 : index
    %4 = vector.load %arg3[%c0_3, %c0_4] : memref<256x256xbf16, #tpu.memory_space<vmem>>, vector<256x256xbf16>
    %cst_5 = arith.constant dense<0.000000e+00> : vector<256x256xf32>
    %5 = tpu.matmul %3, %4, %cst_5 {dimension_numbers = #tpu.dot_dimension_numbers<[1], [0], [0], [1], [0, 0, 1, 1], [], []>} : vector<256x256xbf16>, vector<256x256xbf16>, vector<256x256xf32> -> vector<256x256xf32>
    %c0_6 = arith.constant 0 : index
    %c0_7 = arith.constant 0 : index
    %6 = vector.load %arg4[%c0_6, %c0_7] : memref<256x256xbf16, #tpu.memory_space<vmem>>, vector<256x256xbf16>
    %cst_8 = arith.constant dense<0.000000e+00> : vector<256x256xf32>
    %7 = tpu.matmul %0, %6, %cst_8 {dimension_numbers = #tpu.dot_dimension_numbers<[1], [0], [0], [1], [0, 0, 1, 1], [], []>} : vector<256x256xbf16>, vector<256x256xbf16>, vector<256x256xf32> -> vector<256x256xf32>
    %8 = arith.addf %5, %7 : vector<256x256xf32>
    %c0_9 = arith.constant 0 : index
    %c0_10 = arith.constant 0 : index
    %9 = vector.load %arg5[%c0_9, %c0_10] : memref<1x256xf32, #tpu.memory_space<vmem>>, vector<1x256xf32>
    %10 = vector.broadcast %9 : vector<1x256xf32> to vector<256x256xf32>
    %11 = arith.addf %8, %10 : vector<256x256xf32>
    %cst_11 = arith.constant 0.000000e+00 : f32
    %12 = vector.broadcast %cst_11 : f32 to vector<256x256xf32>
    %13 = arith.maximumf %11, %12 : vector<256x256xf32>
    %14 = arith.extf %0 : vector<256x256xbf16> to vector<256x256xf32>
    %15 = arith.addf %13, %14 : vector<256x256xf32>
    %16 = vector.shape_cast %15 : vector<256x256xf32> to vector<32x8x256xf32>
    %cst_12 = arith.constant dense<0.000000e+00> : vector<32x256xf32>
    %17 = vector.multi_reduction <add>, %16, %cst_12 [1] : vector<32x8x256xf32> to vector<32x256xf32>
    %18 = arith.truncf %17 : vector<32x256xf32> to vector<32x256xbf16>
    %c0_13 = arith.constant 0 : index
    %c0_14 = arith.constant 0 : index
    %19 = vector.load %arg6[%c0_13, %c0_14] : memref<256x128xbf16, #tpu.memory_space<vmem>>, vector<256x128xbf16>
    %cst_15 = arith.constant dense<0.000000e+00> : vector<32x128xf32>
    %20 = tpu.matmul %18, %19, %cst_15 {dimension_numbers = #tpu.dot_dimension_numbers<[1], [0], [0], [1], [0, 0, 1, 1], [], []>} : vector<32x256xbf16>, vector<256x128xbf16>, vector<32x128xf32> -> vector<32x128xf32>
    %c0_16 = arith.constant 0 : index
    %c0_17 = arith.constant 0 : index
    %21 = vector.load %arg7[%c0_16, %c0_17] : memref<1x128xf32, #tpu.memory_space<vmem>>, vector<1x128xf32>
    %22 = vector.broadcast %21 : vector<1x128xf32> to vector<32x128xf32>
    %23 = arith.addf %20, %22 : vector<32x128xf32>
    %cst_18 = arith.constant 0.000000e+00 : f32
    %24 = vector.broadcast %cst_18 : f32 to vector<32x128xf32>
    %25 = arith.maximumf %23, %24 : vector<32x128xf32>
    %26 = arith.truncf %25 : vector<32x128xf32> to vector<32x128xbf16>
    %c0_19 = arith.constant 0 : index
    %c0_20 = arith.constant 0 : index
    %27 = vector.load %arg8[%c0_19, %c0_20] : memref<128x32xbf16, #tpu.memory_space<vmem>>, vector<128x32xbf16>
    %cst_21 = arith.constant dense<0.000000e+00> : vector<32x32xf32>
    %28 = tpu.matmul %26, %27, %cst_21 {dimension_numbers = #tpu.dot_dimension_numbers<[1], [0], [0], [1], [0, 0, 1, 1], [], []>} : vector<32x128xbf16>, vector<128x32xbf16>, vector<32x32xf32> -> vector<32x32xf32>
    %c0_22 = arith.constant 0 : index
    %c0_23 = arith.constant 0 : index
    %29 = vector.load %arg9[%c0_22, %c0_23] : memref<1x32xf32, #tpu.memory_space<vmem>>, vector<1x32xf32>
    %30 = vector.broadcast %29 : vector<1x32xf32> to vector<32x32xf32>
    %31 = arith.addf %28, %30 : vector<32x32xf32>
    %cst_24 = arith.constant 0.000000e+00 : f32
    %32 = vector.broadcast %cst_24 : f32 to vector<32x32xf32>
    %33 = arith.maximumf %31, %32 : vector<32x32xf32>
    %34 = arith.truncf %33 : vector<32x32xf32> to vector<32x32xbf16>
    %c0_25 = arith.constant 0 : index
    %c0_26 = arith.constant 0 : index
    %35 = vector.load %arg10[%c0_25, %c0_26] : memref<32x128xbf16, #tpu.memory_space<vmem>>, vector<32x128xbf16>
    %cst_27 = arith.constant dense<0.000000e+00> : vector<32x128xf32>
    %36 = tpu.matmul %34, %35, %cst_27 {dimension_numbers = #tpu.dot_dimension_numbers<[1], [0], [0], [1], [0, 0, 1, 1], [], []>} : vector<32x32xbf16>, vector<32x128xbf16>, vector<32x128xf32> -> vector<32x128xf32>
    %c0_28 = arith.constant 0 : index
    %c0_29 = arith.constant 0 : index
    %37 = vector.load %arg11[%c0_28, %c0_29] : memref<1x128xf32, #tpu.memory_space<vmem>>, vector<1x128xf32>
    %38 = vector.broadcast %37 : vector<1x128xf32> to vector<32x128xf32>
    %39 = arith.addf %36, %38 : vector<32x128xf32>
    %40 = arith.truncf %39 : vector<32x128xf32> to vector<32x128xbf16>
    %c0_30 = arith.constant 0 : index
    %c0_31 = arith.constant 0 : index
    %41 = vector.load %arg12[%c0_30, %c0_31] : memref<32x128xbf16, #tpu.memory_space<vmem>>, vector<32x128xbf16>
    tpu.vector_store %arg12[%c0_30, %c0_31], %40 {strides = array<i32>} : memref<32x128xbf16, #tpu.memory_space<vmem>>, vector<32x128xbf16>,
    return
  }
  func.func @transform_0(%arg0: i32) -> (i32, i32) {
    %c0_i32 = arith.constant 0 : i32
    %c0_i32_0 = arith.constant 0 : i32
    %c0_i32_1 = arith.constant 0 : i32
    return %c0_i32, %c0_i32_0 : i32, i32
  }
  func.func @transform_1(%arg0: i32) -> (i32, i32) {
    %c0_i32 = arith.constant 0 : i32
    %c0_i32_0 = arith.constant 0 : i32
    return %arg0, %c0_i32 : i32, i32
  }
  func.func @transform_2(%arg0: i32) -> (i32, i32) {
    %c0_i32 = arith.constant 0 : i32
    %c0_i32_0 = arith.constant 0 : i32
    %c0_i32_1 = arith.constant 0 : i32
    return %c0_i32, %c0_i32_0 : i32, i32
  }
  func.func @transform_3(%arg0: i32) -> (i32, i32) {
    %c0_i32 = arith.constant 0 : i32
    %c0_i32_0 = arith.constant 0 : i32
    %c0_i32_1 = arith.constant 0 : i32
    return %c0_i32, %c0_i32_0 : i32, i32
  }
  func.func @transform_4(%arg0: i32) -> (i32, i32) {
    %c0_i32 = arith.constant 0 : i32
    %c0_i32_0 = arith.constant 0 : i32
    %c0_i32_1 = arith.constant 0 : i32
    return %c0_i32, %c0_i32_0 : i32, i32
  }
  func.func @transform_5(%arg0: i32) -> (i32, i32) {
    %c0_i32 = arith.constant 0 : i32
    %c0_i32_0 = arith.constant 0 : i32
    %c0_i32_1 = arith.constant 0 : i32
    return %c0_i32, %c0_i32_0 : i32, i32
  }
  func.func @transform_6(%arg0: i32) -> (i32, i32) {
    %c0_i32 = arith.constant 0 : i32
    %c0_i32_0 = arith.constant 0 : i32
    %c0_i32_1 = arith.constant 0 : i32
    return %c0_i32, %c0_i32_0 : i32, i32
  }
  func.func @transform_7(%arg0: i32) -> (i32, i32) {
    %c0_i32 = arith.constant 0 : i32
    %c0_i32_0 = arith.constant 0 : i32
    %c0_i32_1 = arith.constant 0 : i32
    return %c0_i32, %c0_i32_0 : i32, i32
  }
  func.func @transform_8(%arg0: i32) -> (i32, i32) {
    %c0_i32 = arith.constant 0 : i32
    %c0_i32_0 = arith.constant 0 : i32
    %c0_i32_1 = arith.constant 0 : i32
    return %c0_i32, %c0_i32_0 : i32, i32
  }
  func.func @transform_9(%arg0: i32) -> (i32, i32) {
    %c0_i32 = arith.constant 0 : i32
    %c0_i32_0 = arith.constant 0 : i32
    %c0_i32_1 = arith.constant 0 : i32
    return %c0_i32, %c0_i32_0 : i32, i32
  }
  func.func @transform_10(%arg0: i32) -> (i32, i32) {
    %c0_i32 = arith.constant 0 : i32
    %c0_i32_0 = arith.constant 0 : i32
    %c0_i32_1 = arith.constant 0 : i32
    return %c0_i32, %c0_i32_0 : i32, i32
  }
  func.func @transform_11(%arg0: i32) -> (i32, i32) {
    %c0_i32 = arith.constant 0 : i32
    %c0_i32_0 = arith.constant 0 : i32
    return %arg0, %c0_i32 : i32, i32
  }
}

</mosaic_0001>

<bundles_post_ra>
// kernel: tpu_custom_call.1
= control target key start
LH: loop header
LB: loop body
LE: loop exit
PB: predicated region body
PF: predicated region fallthrough
CT: control target
= control target key end

     0   :  { %s5575_s0 = inlined_call_operand.hbm [shape: bf16[256,256], index: 0, kind: input, shape index: {}]   ;;  %s5576_s1 = inlined_call_operand.hbm [shape: bf16[1024,256], index: 1, kind: input, shape index: {}]   ;;  %s5577_s2 = inlined_call_operand.hbm [shape: bf16[256,256], index: 2, kind: input, shape index: {}]   ;;  %s5578_s3 = inlined_call_operand.hbm [shape: bf16[256,256], index: 3, kind: input, shape index: {}]   ;;  %s5579_s4 = inlined_call_operand.vmem [shape: f32[1,256], index: 4, kind: input, shape index: {}]   ;;  %s5580_s5 = inlined_call_operand.hbm [shape: bf16[256,128], index: 5, kind: input, shape index: {}]   ;;  %s5581_s6 = inlined_call_operand.vmem [shape: f32[1,128], index: 6, kind: input, shape index: {}]   ;;  %s5582_s7 = inlined_call_operand.vmem [shape: bf16[128,32], index: 7, kind: input, shape index: {}]   ;;  %s5583_s8 = inlined_call_operand.vmem [shape: f32[1,32], index: 8, kind: input, shape index: {}]   ;;  %s5584_s9 = inlined_call_operand.vmem [shape: bf16[32,128], index: 9, kind: input, shape index: {}]   ;;  %s5585_s10 = inlined_call_operand.vmem [shape: f32[1,128], index: 10, kind: input, shape index: {}]   ;;  %s5586_s11 = inlined_call_operand.hbm [shape: bf16[128,128], index: 11, kind: output, shape index: {}]  }
   0x1   :  { %5599 = sst [smem:[#allocation27_spill]] %s5583_s8 }
   0x2   :  { %5600 = sst [smem:[#allocation28_spill]] %s5585_s10 }
   0x3   :  { %5601 = sst [smem:[#allocation29_spill]] %s5586_s11 }
   0x4   :  { %16 = vsyncpa [#allocation3], 0 }
   0x5   :  { %17 = vsyncpa [#allocation6], 0 }
   0x6   :  { %19 = vsyncpa [#allocation6 + $0x1], 0 }
   0x7   :  { %20 = vsyncpa [#allocation9], 0 }
   0x8   :  { %21 = vsyncpa [#allocation4], 0 }
   0x9   :  { %23 = vsyncpa [#allocation4 + $0x1], 0  ;;  %s4294_s17 = smov 0   ;;  %s4296_s18 = smov 0  }
   0xa   :  { %s4298_s19 = smov 0   ;;  %s4300_s20 = smov 0  }
   0xb LB: > { %5602 = sst [smem:[#allocation17_spill]] %s4208_s17  ;;  %s4315_s21 = sadd.s32 4294967295, %s4220_s20   ;;  %s4220_s20 = sphi %s4300_s20, %s5688_s20   ;;  %s4216_s19 = sphi %s4298_s19, %s5687_s19   ;;  %s4212_s18 = sphi %s4296_s18, %s5686_s18   ;;  %s4208_s17 = sphi %s4294_s17, %s5685_s17  }
   0xc   : > { %s3303_s22 = sadd.s32 4294967294, %s4220_s20   ;;  %p70_p0 = scmp.ne.s32.totalorder %s4212_s18, %s4208_s17 }
   0xd   : > { %p5588_p1 = scmp.eq.s32.totalorder %s4315_s21, 0  ;;  %p289_p3 = scmp.eq.s32.totalorder %s3303_s22, 3 }
   0xe   : > { %p3304_p5 = scmp.ge.s32.totalorder %s4220_s20, 1  ;;  %p296_p7 = scmp.lt.s32.totalorder %s4220_s20, 5 }
   0xf   : > { %p4324_p4 = por %p5588_p1, %p70_p0  ;;  %p4329_p6 = por %p289_p3, %p70_p0 }
  0x10   : > { %p4334_p8 = pnand %p3304_p5, %p296_p7  ;;  %s4222_s26 = smov [#allocation7]  }
  0x11   : > { %s5603_s23 = scalar_select %p4324_p4, 1, 0 }
  0x12   : > { %s5604_s24 = scalar_select %p4329_p6, 1, 0 }
  0x13   : > { %s5606_s25 = scalar_select %p4334_p8, 1, 0 }
  0x14   : > { %5605 = sst [smem:[#allocation18_spill]] %s5604_s24  ;;  %p3693_p9 = pneg %p4334_p8 }
  0x15   : > { %s321_s27 = sshll.u32 %s4222_s26, 4  ;;  %s4223_s29 = smov [#allocation8]   ;;  %s4340_s27 = int_to_ptr.vmem [resolvable:$true] %s321_s27 }
  0x16   : > { %p4344_p10 = pnand %p3693_p9, %p5588_p1  ;;  %s334_s30 = sshll.u32 %s4223_s29, 4  ;;  %s4348_s30 = int_to_ptr.vmem [resolvable:$true] %s334_s30 }
  0x17   : > { %s4224_s12 = smov [#allocation2]   ;;  %s4000_s16 = scalar_lea.hbm %s5577_s2, 4096 }
  0x18   : > { %s4350_s13 = sshll.u32 %s4224_s12, 4  ;;  %p4001_p11 = scmp.ne.s32.totalorder %s5577_s2, %s4000_s16  ;;  %s309_s13 = int_to_ptr.vmem [resolvable:$true] %s4350_s13 }
  0x19   : > { %p4360_p12 = pneg %p4344_p10  ;;  %p4007_p3 = scmp.lt.u32.totalorder %s4000_s16, %s5577_s2 }
  0x1b   : > { %p4003_p13 = pnand %p4360_p12, %p4001_p11 }
  0x1d   : > { %p4004_p0 = pneg %p4003_p13 }
  0x1f   : > { %p4009_p5 = pnand %p4007_p3, %p4004_p0 }
  0x21   : > { %4012 = shalt.err (!%p4009_p5)
}
  0x22   : > { %s4013_s14 = scalar_lea.vmem %s4340_s27, 4096  ;;  %p4021_p2 = scmp.lt.s32.totalorder %s4340_s27, %s4340_s27 }
  0x23   : > { %p4014_p7 = scmp.ne.s32.totalorder %s4340_s27, %s4013_s14  ;;  %p4022_p6 = scmp.lt.s32.totalorder %s4013_s14, %s4013_s14 }
  0x25   : > { %p4016_p9 = pnand %p4014_p7, %p4360_p12  ;;  %p4023_p11 = por %p4022_p6, %p4021_p2 }
  0x27   : > { %p4017_p1 = pneg %p4016_p9 }
  0x29   : > { %p4024_p13 = pnand %p4023_p11, %p4017_p1 }
  0x2b   : > { %4027 = shalt.err (!%p4024_p13)
}
  0x2c   : > { %s4225_s15 = smov 128   ;;  %s4226_s16 = smov 8  }
  0x2d   : > { %3699 = dma.hbm_to_vmem [thread:$0]  (!%p4344_p10), %s5577_s2, 4096, %s4340_s27, [#allocation6], %s4225_s15, %s4225_s15, %s4226_s16  }
  0x2e   : > { %s4028_s14 = scalar_lea.hbm %s5578_s3, 4096 }
  0x2f   : > { %p4029_p1 = scmp.ne.s32.totalorder %s5578_s3, %s4028_s14  ;;  %p4035_p0 = scmp.lt.u32.totalorder %s4028_s14, %s5578_s3 }
  0x31   : > { %p4031_p2 = pnand %p4029_p1, %p4360_p12 }
  0x33   : > { %p4032_p6 = pneg %p4031_p2 }
  0x35   : > { %p4037_p3 = pnand %p4035_p0, %p4032_p6 }
  0x37   : > { %4040 = shalt.err (!%p4037_p3)
}
  0x38   : > { %s4041_s27 = scalar_lea.vmem %s4348_s30, 4096  ;;  %p4049_p11 = scmp.lt.s32.totalorder %s4348_s30, %s4348_s30 }
  0x39   : > { %p4042_p5 = scmp.ne.s32.totalorder %s4348_s30, %s4041_s27  ;;  %p4050_p13 = scmp.lt.s32.totalorder %s4041_s27, %s4041_s27 }
  0x3b   : > { %p4044_p7 = pnand %p4042_p5, %p4360_p12  ;;  %p4051_p1 = por %p4050_p13, %p4049_p11 }
  0x3d   : > { %p4045_p9 = pneg %p4044_p7 }
  0x3f   : > { %p4052_p2 = pnand %p4051_p1, %p4045_p9 }
  0x41   : > { %4055 = shalt.err (!%p4052_p2)
}
  0x42   : > { %3702 = dma.hbm_to_vmem [thread:$0]  (!%p4344_p10), %s5578_s3, 4096, %s4348_s30, [#allocation9], %s4225_s15, %s4225_s15, %s4226_s16  }
  0x43   : > { %s4056_s22 = scalar_lea.hbm %s5575_s0, 4096 }
  0x44   : > { %p4057_p6 = scmp.ne.s32.totalorder %s5575_s0, %s4056_s22  ;;  %p4063_p5 = scmp.lt.u32.totalorder %s4056_s22, %s5575_s0 }
  0x46   : > { %p4059_p0 = pnand %p4057_p6, %p4360_p12 }
  0x48   : > { %p4060_p3 = pneg %p4059_p0 }
  0x4a   : > { %p4065_p7 = pnand %p4063_p5, %p4060_p3 }
  0x4c   : > { %4068 = shalt.err (!%p4065_p7)
}
  0x4d   : > { %s4069_s27 = scalar_lea.vmem %s309_s13, 4096  ;;  %p4077_p1 = scmp.lt.s32.totalorder %s309_s13, %s309_s13 }
  0x4e   : > { %p4070_p9 = scmp.ne.s32.totalorder %s309_s13, %s4069_s27  ;;  %p4078_p2 = scmp.lt.s32.totalorder %s4069_s27, %s4069_s27 }
  0x50   : > { %p4072_p11 = pnand %p4070_p9, %p4360_p12  ;;  %p4079_p4 = por %p4078_p2, %p4077_p1 }
  0x52   : > { %p4073_p13 = pneg %p4072_p11 }
  0x54   : > { %p4080_p8 = pnand %p4079_p4, %p4073_p13 }
  0x56   : > { %4083 = shalt.err (!%p4080_p8)
}
  0x57   : > { %3696 = dma.hbm_to_vmem [thread:$0]  (!%p4344_p10), %s5575_s0, 4096, %s309_s13, [#allocation3], %s4225_s15, %s4225_s15, %s4226_s16  }
  0x58   : > { %s4227_s10 = smov [#allocation10]   ;;  %s4084_s26 = scalar_lea.hbm %s5580_s5, 2048 }
  0x59   : > { %s350_s11 = sshll.u32 %s4227_s10, 4  ;;  %p4085_p4 = scmp.ne.s32.totalorder %s5580_s5, %s4084_s26  ;;  %s351_s11 = int_to_ptr.vmem [resolvable:$true] %s350_s11 }
  0x5a   : > { %p4091_p0 = scmp.lt.u32.totalorder %s4084_s26, %s5580_s5 }
  0x5b   : > { %p4087_p8 = pnand %p4085_p4, %p4360_p12 }
  0x5d   : > { %p4088_p6 = pneg %p4087_p8 }
  0x5f   : > { %p4093_p3 = pnand %p4091_p0, %p4088_p6 }
  0x61   : > { %4096 = shalt.err (!%p4093_p3)
}
  0x62   : > { %s4097_s13 = scalar_lea.vmem %s351_s11, 2048  ;;  %p4105_p11 = scmp.lt.s32.totalorder %s351_s11, %s351_s11 }
  0x63   : > { %p4098_p5 = scmp.ne.s32.totalorder %s351_s11, %s4097_s13  ;;  %p4106_p13 = scmp.lt.s32.totalorder %s4097_s13, %s4097_s13 }
  0x65   : > { %p4100_p7 = pnand %p4098_p5, %p4360_p12  ;;  %p4107_p1 = por %p4106_p13, %p4105_p11 }
  0x67   : > { %p4101_p9 = pneg %p4100_p7 }
  0x69   : > { %p4108_p2 = pnand %p4107_p1, %p4101_p9 }
  0x6b   : > { %4111 = shalt.err (!%p4108_p2)
}
  0x6c   : > { %s4228_s30 = smov 64   ;;  %s4229_s24 = smov 4  }
  0x6d   : > { %3705 = dma.hbm_to_vmem [thread:$0]  (!%p4344_p10), %s5580_s5, 2048, %s351_s11, [#allocation9], %s4228_s30, %s4228_s30, %s4229_s24  }
  0x6e   : > { %s4451_s17 = sadd.s32 1, %s4220_s20   ;;  %s57_s26 = sadd.s32 1, %s4216_s19 }
  0x6f   : > { %s54_s22 = ssub.s32 %s4220_s20, %s4451_s17  ;;  %p64_p4 = scmp.ne.s32.totalorder %s4216_s19, %s4212_s18 }
  0x70   : > { %p55_p12 = scmp.eq.s32.totalorder %s54_s22, 0  ;;  %p65_p8 = scmp.eq.s32.totalorder %s4220_s20, 0 }
  0x71   : > { %p5609_p0 = scmp.eq.s32.totalorder %s4315_s21, 3  ;;  %p3718_p5 = scmp.lt.s32.totalorder %s4220_s20, 4 }
  0x72   : > { %s4460_s29 = scalar_select %p55_p12, %s4216_s19, %s57_s26  }
  0x73   : > { %p66_p6 = por %p65_p8, %p64_p4  ;;  %p4464_p3 = por %p5609_p0, %p64_p4 }
  0x74   : > { %s379_s28 = sand.u32 1, %s4220_s20   ;;  %s381_s14 = sand.u32 1, %s4216_s19  }
  0x75   : > { %s3310_s11 = sshll.u32 %s381_s14, 8  ;;  %s3490_s27 = sshll.u32 %s4220_s20, 12 }
  0x76   : > { %s4475_s24 = scalar_lea.hbm %s5576_s1, %s3490_s27  ;;  %s383_s8 = scalar_lea.vmem [#allocation5], %s3310_s11 }
  0x77   : > { %s391_s10 = sshll.u32 %s383_s8, 4  ;;  %p4477_p10 = pnand %p3718_p5, %p66_p6  ;;  %s4481_s10 = int_to_ptr.vmem [resolvable:$true] %s391_s10 }
  0x78   : > { %s4483_s26 = scalar_lea.sflag [#allocation6], %s379_s28  ;;  %s4112_s14 = scalar_lea.hbm %s4475_s24, 4096 }
  0x79   : > { %p4113_p7 = scmp.ne.s32.totalorder %s4475_s24, %s4112_s14  ;;  %p4114_p9 = pneg %p4477_p10 }
  0x7a   : > { %s4117_s13 = scalar_lea.hbm %s5576_s1, 16384  ;;  %p4118_p1 = scmp.lt.u32.totalorder %s4475_s24, %s5576_s1 }
  0x7b   : > { %p4115_p11 = pnand %p4114_p9, %p4113_p7  ;;  %p4119_p2 = scmp.lt.u32.totalorder %s4117_s13, %s4112_s14 }
  0x7c   : > { %p4121_p4 = scmp.lt.u32.totalorder %s4112_s14, %s4475_s24 }
  0x7d   : > { %p4116_p13 = pneg %p4115_p11  ;;  %p4120_p12 = por %p4119_p2, %p4118_p1 }
  0x7f   : > { %p4122_p8 = por %p4121_p4, %p4120_p12 }
  0x81   : > { %p4123_p6 = pnand %p4122_p8, %p4116_p13 }
  0x83   : > { %4126 = shalt.err (!%p4123_p6)
}
  0x84   : > { %s4127_s28 = scalar_lea.vmem %s4481_s10, 4096  ;;  %s4230_s11 = smov [#allocation5]  }
  0x85   : > { %p4128_p0 = scmp.ne.s32.totalorder %s4481_s10, %s4127_s28  ;;  %s4132_s27 = sshll.u32 %s4230_s11, 4  ;;  %s4133_s27 = int_to_ptr.vmem [resolvable:$false] %s4132_s27 }
  0x86   : > { %s4134_s30 = scalar_lea.vmem %s4133_s27, 8192  ;;  %p4135_p11 = scmp.lt.s32.totalorder %s4481_s10, %s4133_s27 }
  0x87   : > { %p4130_p5 = pnand %p4128_p0, %p4114_p9  ;;  %p4136_p1 = scmp.lt.s32.totalorder %s4134_s30, %s4127_s28 }
  0x89   : > { %p4131_p7 = pneg %p4130_p5  ;;  %p4137_p2 = por %p4136_p1, %p4135_p11 }
  0x8b   : > { %p4138_p12 = pnand %p4137_p2, %p4131_p7 }
  0x8d   : > { %4141 = shalt.err (!%p4138_p12)
}
  0x8e   : > { %3709 = dma.hbm_to_vmem [thread:$0]  (!%p4477_p10), %s4475_s24, 4096, %s4481_s10, %s4483_s26, %s4225_s15, %s4225_s15, %s4226_s16  }
  0x8f   : > { %p5612_p9 = scmp.ne.s32.totalorder %s5606_s25, 0 }
  0x91   : > { %403 = sbr.rel (%p5612_p9) target bundleno = 1565 (0x61d), region = 64 }
  0x98   : > { %p5613_p13 = scmp.eq.s32.totalorder %s4315_s21, 0 }
  0x9a   : > { %4187 = dma.done.wait (%p5613_p13), [#allocation3], 4096   ;;  %p5614_p4 = pmov %p5613_p13 }
  0x9b   : > { %s409_s22 = sand.u32 1, %s4315_s21   ;;  %s4522_s14 = sand.u32 1, %s4212_s18  }
  0x9c   : > { %4189 = vsyncadd (%p5614_p4), [#allocation3], 4294963200  ;;  %s3316_s13 = sshll.u32 %s4522_s14, 8  ;;  %s410_s8 = scalar_lea.sflag [#allocation6], %s409_s22 }
  0x9d   : > { %s4525_s28 = scalar_lea.vmem [#allocation5], %s3316_s13  ;;  %p5615_p10 = scmp.ne.s32.totalorder %s5603_s23, 0 }
  0x9f   : > { %4191 = dma.done.wait (%p5615_p10), %s410_s8, 4096  }
  0xa0   : > { %4193 = vsyncadd (%p5615_p10), %s410_s8, 4294963200  ;;  %p5616_p8 = pmov %p5614_p4 }
  0xa1   : > { %p5617_p6 = pmov %p5614_p4 }
  0xa2   : > { %4195 = dma.done.wait (%p5616_p8), [#allocation6], 4096  }
  0xa3   : > { %4197 = vsyncadd (%p5617_p6), [#allocation6], 4294963200  ;;  %p5618_p0 = pmov %p5614_p4 }
  0xa5   : > { %4199 = dma.done.wait (%p5618_p0), [#allocation9], 6144   ;;  %p5619_p5 = pmov %p5618_p0 }
  0xa6   : > { %v467_v0 = vld [vmem:[%s4525_s28] sm:$0xff]  ;;  %v468_v1 = vld [vmem:[%s4525_s28 + $0x8] sm:$0xff]  ;;  %v469_v2 = vld [vmem:[%s4525_s28 + $0x10] sm:$0xff]  ;;  %vm2729_vm0 = vcmask 1041409   ;;  %vm2731_vm1 = vcmask 1042434   ;;  %vm2733_vm2 = vcmask 1043459  }
  0xa7   : > { %4201 = vsyncadd (%p5619_p5), [#allocation9], 4294961152  ;;  %v4542_v3 = vcombine.high %v467_v0, %v468_v1  ;;  %v4544_v4 = vcombine.low %v467_v0, %v468_v1  ;;  %v470_v5 = vld [vmem:[%s4525_s28 + $0x18] sm:$0xff]  ;;  %v471_v7 = vld [vmem:[%s4525_s28 + $0x20] sm:$0xff]  ;;  %vm2735_vm3 = vcmask 1044484   ;;  %vm2737_vm4 = vcmask 1045509  }
  0xa8   : > { %v4547_v6 = vcombine.high %v469_v2, %v470_v5  ;;  %v472_v8 = vld [vmem:[%s4525_s28 + $0x28] sm:$0xff]  ;;  %v477_v9 = vld [vmem:[%s4525_s28 + $0x50] sm:$0xff]  ;;  %v478_v10 = vld [vmem:[%s4525_s28 + $0x58] sm:$0xff]  ;;  %v4555_v11 = vcombine.low %v469_v2, %v470_v5  ;;  %vm2739_vm5 = vcmask 1046534   ;;  %vm2741_vm6 = vcmask 1047559   ;;  %s5678_s8 = sld [smem:[#allocation27_spill]] }
  0xa9   : > { %851 = vmatprep.subr.bf16.mxu0 %v4542_v3  ;;  %v3364_v12 = vcombine.high %v477_v9, %v478_v10  ;;  %v4558_v13 = vcombine.high %v471_v7, %v472_v8  ;;  %v473_v14 = vld [vmem:[%s4525_s28 + $0x30] sm:$0xff]  ;;  %v474_v15 = vld [vmem:[%s4525_s28 + $0x38] sm:$0xff]  ;;  %v4563_v16 = vcombine.low %v471_v7, %v472_v8  ;;  %v475_v18 = vld [vmem:[%s4525_s28 + $0x40] sm:$0xff]  ;;  %v4583_v26 = vcombine.low %v477_v9, %v478_v10  ;;  %s5679_s15 = sld [smem:[#allocation28_spill]]  ;;  %s3495_s10 = sshll.u32 %s4315_s21, 8 }
  0xaa   : > { %852 = vmatpush1.bf16.msra.mxu0 %v4544_v4  ;;  %v4566_v17 = vcombine.high %v473_v14, %v474_v15  ;;  %v476_v19 = vld [vmem:[%s4525_s28 + $0x48] sm:$0xff]  ;;  %v4571_v21 = vcombine.low %v473_v14, %v474_v15  ;;  %v479_v24 = vld [vmem:[%s4525_s28 + $0x60] sm:$0xff]  ;;  %v481_v28 = vld [vmem:[%s4525_s28 + $0x70] sm:$0xff]  ;;  %vm3100_vm7 = vcmask 261120   ;;  %s5680_s27 = sld [smem:[#allocation29_spill]]  ;;  %s3177_s22 = scalar_lea.sflag [#allocation4], %s4522_s14 }
  0xab   : > { %853 = vmatprep.subr.bf16.mxu0 %v4547_v6  ;;  %1382 = vmatprep.mubr.bf16.mxu1 %v3364_v12  ;;  %v3800_v20 = vld [vmem:[#allocation2 + $0x4] ss:$8 sps:$4 sm:$0xff]   ;;  %v4574_v22 = vcombine.high %v475_v18, %v476_v19  ;;  %v4577_v23 = vcombine.low %v475_v18, %v476_v19  ;;  %v482_v29 = vld [vmem:[%s4525_s28 + $0x78] sm:$0xff]  ;;  %v4591_v31 = vld [vmem:[#allocation8] ss:$8 sps:$4 sm:$0xff]   ;;  %s4231_s21 = smov [#allocation11]  }
  0xac   : > { %883 = vmatprep.mubr.bf16.mxu0 %v3800_v20  ;;  %v480_v25 = vld [vmem:[%s4525_s28 + $0x68] sm:$0xff]  ;;  %v4596_v33 = vld [vmem:[#allocation8 + $0x14] ss:$8 sps:$4 sm:$0xff]   ;;  %v4599_v34 = vcombine.high %v481_v28, %v482_v29  ;;  %v483_v35 = vld [vmem:[%s4525_s28 + $0x80] sm:$0xff]  ;;  %v4611_v39 = vcombine.low %v481_v28, %v482_v29 }
  0xad   : > { %v4585_v27 = vcombine.high %v479_v24, %v480_v25  ;;  %v4589_v30 = vld [vmem:[#allocation8 + $0x4] ss:$8 sps:$4 sm:$0xff]   ;;  %v4594_v32 = vcombine.low %v479_v24, %v480_v25  ;;  %v4605_v37 = vld [vmem:[#allocation8 + $0x10] ss:$8 sps:$4 sm:$0xff]   ;;  %v4619_v43 = vld [vmem:[#allocation8 + $0x20] ss:$8 sps:$4 sm:$0xff]  }
  0xae   : > { %854 = vmatpush1.bf16.msra.mxu0 %v4555_v11  ;;  %3577 = vmatprep.subr.bf16.mxu1 %v4589_v30  ;;  %v484_v36 = vld [vmem:[%s4525_s28 + $0x88] sm:$0xff]  ;;  %v485_v41 = vld [vmem:[%s4525_s28 + $0x90] sm:$0xff]  ;;  %v486_v42 = vld [vmem:[%s4525_s28 + $0x98] sm:$0xff] }
  0xaf   : > { %855 = vmatprep.subr.bf16.mxu0 %v4558_v13  ;;  %3593 = vmatpush1.bf16.msra.mxu1 %v4591_v31  ;;  %v4608_v38 = vld [vmem:[#allocation8 + $0x24] ss:$8 sps:$4 sm:$0xff]   ;;  %v4614_v40 = vcombine.high %v483_v35, %v484_v36  ;;  %v4622_v44 = vld [vmem:[#allocation8 + $0x34] ss:$8 sps:$4 sm:$0xff]   ;;  %v4625_v45 = vcombine.low %v483_v35, %v484_v36  ;;  %v4628_v46 = vcombine.high %v485_v41, %v486_v42  ;;  %v4633_v49 = vld [vmem:[#allocation8 + $0x30] ss:$8 sps:$4 sm:$0xff]  }
  0xb0   : > { %3578 = vmatprep.subr.bf16.mxu1 %v4596_v33  ;;  %v487_v47 = vld [vmem:[%s4525_s28 + $0xa0] sm:$0xff]  ;;  %v488_v48 = vld [vmem:[%s4525_s28 + $0xa8] sm:$0xff]  ;;  %v4639_v51 = vcombine.low %v485_v41, %v486_v42  ;;  %v489_v53 = vld [vmem:[%s4525_s28 + $0xb0] sm:$0xff]  ;;  %s5532_s30 = scalar_lea.hbm %s5680_s27, %s3495_s10 }
  0xb1   : > { %v4636_v50 = vld [vmem:[#allocation8 + $0x44] ss:$8 sps:$4 sm:$0xff]   ;;  %v4642_v52 = vcombine.high %v487_v47, %v488_v48  ;;  %v490_v54 = vld [vmem:[%s4525_s28 + $0xb8] sm:$0xff]  ;;  %v4647_v55 = vld [vmem:[#allocation8 + $0x40] ss:$8 sps:$4 sm:$0xff]   ;;  %v4653_v57 = vcombine.low %v487_v47, %v488_v48 }
  0xb2   : > { %856 = vmatpush1.bf16.msra.mxu0 %v4563_v16  ;;  %v4650_v56 = vld [vmem:[#allocation8 + $0x54] ss:$8 sps:$4 sm:$0xff]   ;;  %v4656_v58 = vcombine.high %v489_v53, %v490_v54  ;;  %v491_v59 = vld [vmem:[%s4525_s28 + $0xc0] sm:$0xff]  ;;  %v492_v60 = vld [vmem:[%s4525_s28 + $0xc8] sm:$0xff]  ;;  %v4667_v63 = vcombine.low %v489_v53, %v490_v54 }
  0xb3   : > { %857 = vmatprep.subr.bf16.mxu0 %v4566_v17  ;;  %3594 = vmatpush1.bf16.msra.mxu1 %v4605_v37  ;;  %v4661_v61 = vld [vmem:[#allocation8 + $0x50] ss:$8 sps:$4 sm:$0xff]   ;;  %v4664_v62 = vld [vmem:[#allocation8 + $0x64] ss:$8 sps:$4 sm:$0xff]   ;;  %v4671_v1 = vcombine.high %v491_v59, %v492_v60  ;;  %v4675_v5 = vld [vmem:[#allocation8 + $0x60] ss:$8 sps:$4 sm:$0xff]   ;;  %v4681_v8 = vcombine.low %v491_v59, %v492_v60 }
  0xb4   : > { %3579 = vmatprep.subr.bf16.mxu1 %v4608_v38  ;;  %v493_v0 = vld [vmem:[%s4525_s28 + $0xd0] sm:$0xff]  ;;  %v494_v2 = vld [vmem:[%s4525_s28 + $0xd8] sm:$0xff]  ;;  %v495_v9 = vld [vmem:[%s4525_s28 + $0xe0] sm:$0xff] }
  0xb5   : > { %v4677_v7 = vld [vmem:[#allocation8 + $0x74] ss:$8 sps:$4 sm:$0xff]   ;;  %v496_v10 = vld [vmem:[%s4525_s28 + $0xe8] sm:$0xff]  ;;  %v4688_v14 = vcombine.high %v493_v0, %v494_v2  ;;  %v4695_v18 = vcombine.low %v493_v0, %v494_v2  ;;  %v4711_v35 = vld [vmem:[#allocation8 + $0x90] ss:$8 sps:$4 sm:$0xff]  }
  0xb6   : > { %858 = vmatpush1.bf16.msra.mxu0 %v4571_v21  ;;  %v4692_v15 = vld [vmem:[#allocation8 + $0x84] ss:$8 sps:$4 sm:$0xff]   ;;  %v497_v19 = vld [vmem:[%s4525_s28 + $0xf0] sm:$0xff]  ;;  %v498_v20 = vld [vmem:[%s4525_s28 + $0xf8] sm:$0xff]  ;;  %v4702_v25 = vcombine.high %v495_v9, %v496_v10  ;;  %v4709_v29 = vcombine.low %v495_v9, %v496_v10 }
  0xb7   : > { %859 = vmatprep.subr.bf16.mxu0 %v4574_v22  ;;  %3595 = vmatpush1.bf16.msra.mxu1 %v4619_v43  ;;  %v4699_v24 = vld [vmem:[#allocation8 + $0x80] ss:$8 sps:$4 sm:$0xff]   ;;  %v4704_v28 = vld [vmem:[#allocation8 + $0x94] ss:$8 sps:$4 sm:$0xff]   ;;  %v4714_v36 = vcombine.high %v497_v19, %v498_v20  ;;  %v4718_v41 = vld [vmem:[#allocation8 + $0xa4] ss:$8 sps:$4 sm:$0xff]   ;;  %v4721_v42 = vcombine.low %v497_v19, %v498_v20 }
  0xb8   : > { %3580 = vmatprep.subr.bf16.mxu1 %v4622_v44  ;;  %v4725_v47 = vld [vmem:[#allocation8 + $0xa0] ss:$8 sps:$4 sm:$0xff]   ;;  %v4728_v53 = vld [vmem:[#allocation8 + $0xb4] ss:$8 sps:$4 sm:$0xff]   ;;  %v4733_v59 = vld [vmem:[#allocation8 + $0xb0] ss:$8 sps:$4 sm:$0xff]  }
  0xb9   : > { %v3798_v48 = vld [vmem:[#allocation2] ss:$8 sps:$4 sm:$0xff]   ;;  %v3801_v54 = vld [vmem:[#allocation2 + $0x14] ss:$8 sps:$4 sm:$0xff]   ;;  %v4736_v60 = vld [vmem:[#allocation8 + $0xc4] ss:$8 sps:$4 sm:$0xff]  }
  0xba   : > { %860 = vmatpush1.bf16.msra.mxu0 %v4577_v23  ;;  %v3803_v0 = vld [vmem:[#allocation2 + $0x10] ss:$8 sps:$4 sm:$0xff]   ;;  %v4741_v2 = vld [vmem:[#allocation8 + $0xc0] ss:$8 sps:$4 sm:$0xff]   ;;  %v4744_v9 = vld [vmem:[#allocation8 + $0xd4] ss:$8 sps:$4 sm:$0xff]  }
  0xbb   : > { %861 = vmatprep.subr.bf16.mxu0 %v3364_v12  ;;  %3596 = vmatpush1.bf16.msra.mxu1 %v4633_v49  ;;  %v4685_v12 = vld [vmem:[#allocation8 + $0x70] ss:$8 sps:$4 sm:$0xff]   ;;  %v4749_v19 = vld [vmem:[#allocation8 + $0xe4] ss:$8 sps:$4 sm:$0xff]   ;;  %v4757_v20 = vld [vmem:[#allocation8 + $0xf4] ss:$8 sps:$4 sm:$0xff]  }
  0xbc   : > { %3581 = vmatprep.subr.bf16.mxu1 %v4636_v50  ;;  %v4746_v10 = vld [vmem:[#allocation8 + $0xd0] ss:$8 sps:$4 sm:$0xff]  }
  0xbe   : > { %862 = vmatpush1.bf16.msra.mxu0 %v4583_v26 }
  0xbf   : > { %863 = vmatprep.subr.bf16.mxu0 %v4585_v27  ;;  %3597 = vmatpush1.bf16.msra.mxu1 %v4647_v55 }
  0xc0   : > { %3582 = vmatprep.subr.bf16.mxu1 %v4650_v56 }
  0xc2   : > { %864 = vmatpush1.bf16.msra.mxu0 %v4594_v32 }
  0xc3   : > { %865 = vmatprep.subr.bf16.mxu0 %v4599_v34  ;;  %3598 = vmatpush1.bf16.msra.mxu1 %v4661_v61 }
  0xc4   : > { %3583 = vmatprep.subr.bf16.mxu1 %v4664_v62 }
  0xc6   : > { %866 = vmatpush1.bf16.msra.mxu0 %v4611_v39 }
  0xc7   : > { %867 = vmatprep.subr.bf16.mxu0 %v4614_v40  ;;  %3599 = vmatpush1.bf16.msra.mxu1 %v4675_v5 }
  0xc8   : > { %3584 = vmatprep.subr.bf16.mxu1 %v4677_v7 }
  0xca   : > { %868 = vmatpush1.bf16.msra.mxu0 %v4625_v45 }
  0xcb   : > { %869 = vmatprep.subr.bf16.mxu0 %v4628_v46  ;;  %3600 = vmatpush1.bf16.msra.mxu1 %v4685_v12 }
  0xcc   : > { %3585 = vmatprep.subr.bf16.mxu1 %v4692_v15 }
  0xce   : > { %870 = vmatpush1.bf16.msra.mxu0 %v4639_v51 }
  0xcf   : > { %871 = vmatprep.subr.bf16.mxu0 %v4642_v52  ;;  %3601 = vmatpush1.bf16.msra.mxu1 %v4699_v24 }
  0xd0   : > { %3586 = vmatprep.subr.bf16.mxu1 %v4704_v28 }
  0xd2   : > { %872 = vmatpush1.bf16.msra.mxu0 %v4653_v57 }
  0xd3   : > { %873 = vmatprep.subr.bf16.mxu0 %v4656_v58  ;;  %3602 = vmatpush1.bf16.msra.mxu1 %v4711_v35 }
  0xd4   : > { %3587 = vmatprep.subr.bf16.mxu1 %v4718_v41 }
  0xd6   : > { %874 = vmatpush1.bf16.msra.mxu0 %v4667_v63 }
  0xd7   : > { %875 = vmatprep.subr.bf16.mxu0 %v4671_v1  ;;  %3603 = vmatpush1.bf16.msra.mxu1 %v4725_v47 }
  0xd8   : > { %3588 = vmatprep.subr.bf16.mxu1 %v4728_v53 }
  0xda   : > { %876 = vmatpush1.bf16.msra.mxu0 %v4681_v8 }
  0xdb   : > { %877 = vmatprep.subr.bf16.mxu0 %v4688_v14  ;;  %3604 = vmatpush1.bf16.msra.mxu1 %v4733_v59 }
  0xdc   : > { %3589 = vmatprep.subr.bf16.mxu1 %v4736_v60 }
  0xde   : > { %878 = vmatpush1.bf16.msra.mxu0 %v4695_v18 }
  0xdf   : > { %879 = vmatprep.subr.bf16.mxu0 %v4702_v25  ;;  %3605 = vmatpush1.bf16.msra.mxu1 %v4741_v2 }
  0xe0   : > { %3590 = vmatprep.subr.bf16.mxu1 %v4744_v9 }
  0xe2   : > { %880 = vmatpush1.bf16.msra.mxu0 %v4709_v29 }
  0xe3   : > { %881 = vmatprep.subr.bf16.mxu0 %v4714_v36  ;;  %3606 = vmatpush1.bf16.msra.mxu1 %v4746_v10 }
  0xe4   : > { %3591 = vmatprep.subr.bf16.mxu1 %v4749_v19 }
  0xe6   : > { %882 = vmatpush1.bf16.msra.mxu0 %v4721_v42 }
  0xe7   : > { %1300 = vmatprep.subr.bf16.mxu0 %v4589_v30  ;;  %v3804_v30 = vld [vmem:[#allocation2 + $0x24] ss:$8 sps:$4 sm:$0xff]  }
  0xe9   : > { %884 = vmatmul.mubr.bf16.vlgmr.msra.gmra.mrb[0].mxu0 %v3798_v48  ;;  %v3896_v48 = vld [vmem:[#allocation7 + $0x4] ss:$8 sps:$4 sm:$0xff]  }
  0xea   : > { %893 = vmatprep.mubr.bf16.mxu0 %v3801_v54  ;;  %1301 = vmatpush1.bf16.msra.mxu0 %v4591_v31  ;;  %v4754_v31 = vld [vmem:[#allocation8 + $0xe0] ss:$8 sps:$4 sm:$0xff]   ;;  %v3899_v54 = vld [vmem:[#allocation7 + $0x14] ss:$8 sps:$4 sm:$0xff]  }
  0xeb   : > { %1302 = vmatprep.subr.bf16.mxu0 %v4596_v33  ;;  %v3806_v33 = vld [vmem:[#allocation2 + $0x20] ss:$8 sps:$4 sm:$0xff]   ;;  %3607 = vmatpush1.bf16.msra.mxu1 %v4754_v31 }
  0xec   : > { %3592 = vmatprep.subr.bf16.mxu1 %v4757_v20 }
  0xee   : > { %1303 = vmatpush1.bf16.msra.mxu0 %v4605_v37  ;;  %v3807_v37 = vld [vmem:[#allocation2 + $0x34] ss:$8 sps:$4 sm:$0xff]  }
  0xef   : > { %1304 = vmatprep.subr.bf16.mxu0 %v4608_v38  ;;  %v4762_v38 = vld [vmem:[#allocation8 + $0xf0] ss:$8 sps:$4 sm:$0xff]  }
  0xf0   : > { %3608 = vmatpush1.bf16.msra.mxu1 %v4762_v38 }
  0xf1   : > { %894 = vmatmul.mubr.bf16.gmra.mrb[4].mxu0 %v3803_v0  ;;  %v3810_v0 = vld [vmem:[#allocation2 + $0x44] ss:$8 sps:$4 sm:$0xff]   ;;  %1653 = vmatprep.subr.bf16.mxu1 %v3896_v48  ;;  %v3849_v48 = vld [vmem:[#allocation2 + $0xb4] ss:$8 sps:$4 sm:$0xff]  }
  0xf2   : > { %903 = vmatprep.mubr.bf16.mxu0 %v3804_v30  ;;  %1305 = vmatpush1.bf16.msra.mxu0 %v4619_v43  ;;  %v3894_v43 = vld [vmem:[#allocation7] ss:$8 sps:$4 sm:$0xff]   ;;  %v3813_v30 = vld [vmem:[#allocation2 + $0x54] ss:$8 sps:$4 sm:$0xff]  }
  0xf3   : > { %1306 = vmatprep.subr.bf16.mxu0 %v4622_v44  ;;  %v3809_v44 = vld [vmem:[#allocation2 + $0x30] ss:$8 sps:$4 sm:$0xff]   ;;  %1383 = vmatmul.mubr.bf16.vlgmr.msra.gmra.mrb[0].mxu1 %v4583_v26 }
  0xf4   : > { %1654 = vmatpush1.bf16.msra.mxu1 %v3894_v43  ;;  %1392 = vmatprep.mubr.bf16.mxu1 %v4585_v27  ;;  %v3903_v26 = vld [vmem:[#allocation7 + $0x30] ss:$8 sps:$4 sm:$0xff]   ;;  %v3908_v27 = vld [vmem:[#allocation7 + $0x44] ss:$8 sps:$4 sm:$0xff]   ;;  %v3941_v43 = vld [vmem:[#allocation7 + $0xf4] ss:$8 sps:$4 sm:$0xff]  }
  0xf5   : > { %1655 = vmatprep.subr.bf16.mxu1 %v3899_v54  ;;  %v3860_v54 = vld [vmem:[#allocation2 + $0xc0] ss:$8 sps:$4 sm:$0xff]  }
  0xf6   : > { %1307 = vmatpush1.bf16.msra.mxu0 %v4633_v49  ;;  %v3897_v49 = vld [vmem:[#allocation7 + $0x10] ss:$8 sps:$4 sm:$0xff]  }
  0xf7   : > { %1308 = vmatprep.subr.bf16.mxu0 %v4636_v50  ;;  %v3902_v50 = vld [vmem:[#allocation7 + $0x24] ss:$8 sps:$4 sm:$0xff]  }
  0xf8   : > { %1656 = vmatpush1.bf16.msra.mxu1 %v3897_v49  ;;  %v3885_v49 = vld [vmem:[#allocation2 + $0xf4] ss:$8 sps:$4 sm:$0xff]  }
  0xf9   : > { %904 = vmatmul.mubr.bf16.gmra.mrb[8].mxu0 %v3806_v33  ;;  %1657 = vmatprep.subr.bf16.mxu1 %v3902_v50  ;;  %v3935_v33 = vld [vmem:[#allocation7 + $0xd4] ss:$8 sps:$4 sm:$0xff]  }
  0xfa   : > { %913 = vmatprep.mubr.bf16.mxu0 %v3807_v37  ;;  %1309 = vmatpush1.bf16.msra.mxu0 %v4647_v55  ;;  %v3900_v55 = vld [vmem:[#allocation7 + $0x20] ss:$8 sps:$4 sm:$0xff]  }
  0xfb   : > { %1310 = vmatprep.subr.bf16.mxu0 %v4650_v56  ;;  %v3812_v56 = vld [vmem:[#allocation2 + $0x40] ss:$8 sps:$4 sm:$0xff]   ;;  %1393 = vmatmul.mubr.bf16.gmra.mrb[4].mxu1 %v4594_v32  ;;  %v3816_v32 = vld [vmem:[#allocation2 + $0x64] ss:$8 sps:$4 sm:$0xff]  }
  0xfc   : > { %1658 = vmatpush1.bf16.msra.mxu1 %v3900_v55  ;;  %1402 = vmatprep.mubr.bf16.mxu1 %v4599_v34  ;;  %v3909_v34 = vld [vmem:[#allocation7 + $0x50] ss:$8 sps:$4 sm:$0xff]   ;;  %v3936_v37 = vld [vmem:[#allocation7 + $0xe0] ss:$8 sps:$4 sm:$0xff]  }
  0xfe   : > { %1311 = vmatpush1.bf16.msra.mxu0 %v4661_v61  ;;  %v3905_v61 = vld [vmem:[#allocation7 + $0x34] ss:$8 sps:$4 sm:$0xff]  }
  0xff   : > { %1312 = vmatprep.subr.bf16.mxu0 %v4664_v62  ;;  %1659 = vmatprep.subr.bf16.mxu1 %v3905_v61  ;;  %v3906_v62 = vld [vmem:[#allocation7 + $0x40] ss:$8 sps:$4 sm:$0xff]  }
 0x100   : > { %1660 = vmatpush1.bf16.msra.mxu1 %v3903_v26 }
 0x101   : > { %914 = vmatmul.mubr.bf16.gmra.mrb[12].mxu0 %v3809_v44  ;;  %1661 = vmatprep.subr.bf16.mxu1 %v3908_v27  ;;  %v3858_v44 = vld [vmem:[#allocation2 + $0xc4] ss:$8 sps:$4 sm:$0xff]  }
 0x102   : > { %923 = vmatprep.mubr.bf16.mxu0 %v3810_v0  ;;  %1313 = vmatpush1.bf16.msra.mxu0 %v4675_v5  ;;  %v3815_v5 = vld [vmem:[#allocation2 + $0x50] ss:$8 sps:$4 sm:$0xff]   ;;  %v3867_v0 = vld [vmem:[#allocation2 + $0xd4] ss:$8 sps:$4 sm:$0xff]  }
 0x103   : > { %1314 = vmatprep.subr.bf16.mxu0 %v4677_v7  ;;  %v3911_v7 = vld [vmem:[#allocation7 + $0x54] ss:$8 sps:$4 sm:$0xff]   ;;  %1403 = vmatmul.mubr.bf16.gmra.mrb[8].mxu1 %v4611_v39 }
 0x104   : > { %1662 = vmatpush1.bf16.msra.mxu1 %v3906_v62  ;;  %1412 = vmatprep.mubr.bf16.mxu1 %v4614_v40  ;;  %v3819_v39 = vld [vmem:[#allocation2 + $0x74] ss:$8 sps:$4 sm:$0xff]   ;;  %v3915_v40 = vld [vmem:[#allocation7 + $0x70] ss:$8 sps:$4 sm:$0xff]  }
 0x105   : > { %1663 = vmatprep.subr.bf16.mxu1 %v3911_v7 }
 0x106   : > { %1315 = vmatpush1.bf16.msra.mxu0 %v4685_v12  ;;  %v3914_v12 = vld [vmem:[#allocation7 + $0x64] ss:$8 sps:$4 sm:$0xff]  }
 0x107   : > { %1316 = vmatprep.subr.bf16.mxu0 %v4692_v15  ;;  %v3912_v15 = vld [vmem:[#allocation7 + $0x60] ss:$8 sps:$4 sm:$0xff]  }
 0x108   : > { %1664 = vmatpush1.bf16.msra.mxu1 %v3909_v34 }
 0x109   : > { %924 = vmatmul.mubr.bf16.gmra.mrb[16].mxu0 %v3812_v56  ;;  %1665 = vmatprep.subr.bf16.mxu1 %v3914_v12 }
 0x10a   : > { %933 = vmatprep.mubr.bf16.mxu0 %v3813_v30  ;;  %1317 = vmatpush1.bf16.msra.mxu0 %v4699_v24  ;;  %v3818_v24 = vld [vmem:[#allocation2 + $0x60] ss:$8 sps:$4 sm:$0xff]  }
 0x10b   : > { %1318 = vmatprep.subr.bf16.mxu0 %v4704_v28  ;;  %v3917_v28 = vld [vmem:[#allocation7 + $0x74] ss:$8 sps:$4 sm:$0xff]   ;;  %1413 = vmatmul.mubr.bf16.gmra.mrb[12].mxu1 %v4625_v45  ;;  %v3822_v45 = vld [vmem:[#allocation2 + $0x84] ss:$8 sps:$4 sm:$0xff]  }
 0x10c   : > { %1422 = vmatprep.mubr.bf16.mxu1 %v4628_v46  ;;  %1666 = vmatpush1.bf16.msra.mxu1 %v3912_v15  ;;  %v3921_v46 = vld [vmem:[#allocation7 + $0x90] ss:$8 sps:$4 sm:$0xff]  }
 0x10d   : > { %1667 = vmatprep.subr.bf16.mxu1 %v3917_v28 }
 0x10e   : > { %1319 = vmatpush1.bf16.msra.mxu0 %v4711_v35  ;;  %v3920_v35 = vld [vmem:[#allocation7 + $0x84] ss:$8 sps:$4 sm:$0xff]  }
 0x10f   : > { %1320 = vmatprep.subr.bf16.mxu0 %v4718_v41  ;;  %v3918_v41 = vld [vmem:[#allocation7 + $0x80] ss:$8 sps:$4 sm:$0xff]  }
 0x110   : > { %1668 = vmatpush1.bf16.msra.mxu1 %v3915_v40 }
 0x111   : > { %934 = vmatmul.mubr.bf16.gmra.mrb[20].mxu0 %v3815_v5  ;;  %1669 = vmatprep.subr.bf16.mxu1 %v3920_v35 }
 0x112   : > { %943 = vmatprep.mubr.bf16.mxu0 %v3816_v32  ;;  %1321 = vmatpush1.bf16.msra.mxu0 %v4725_v47  ;;  %v3821_v47 = vld [vmem:[#allocation2 + $0x70] ss:$8 sps:$4 sm:$0xff]  }
 0x113   : > { %1322 = vmatprep.subr.bf16.mxu0 %v4728_v53  ;;  %v3923_v53 = vld [vmem:[#allocation7 + $0x94] ss:$8 sps:$4 sm:$0xff]   ;;  %1423 = vmatmul.mubr.bf16.gmra.mrb[16].mxu1 %v4639_v51 }
 0x114   : > { %1432 = vmatprep.mubr.bf16.mxu1 %v4642_v52  ;;  %1670 = vmatpush1.bf16.msra.mxu1 %v3918_v41  ;;  %v3831_v51 = vld [vmem:[#allocation2 + $0x94] ss:$8 sps:$4 sm:$0xff]   ;;  %v3927_v52 = vld [vmem:[#allocation7 + $0xb0] ss:$8 sps:$4 sm:$0xff]  }
 0x115   : > { %1671 = vmatprep.subr.bf16.mxu1 %v3923_v53 }
 0x116   : > { %1323 = vmatpush1.bf16.msra.mxu0 %v4733_v59  ;;  %v3926_v59 = vld [vmem:[#allocation7 + $0xa4] ss:$8 sps:$4 sm:$0xff]  }
 0x117   : > { %1324 = vmatprep.subr.bf16.mxu0 %v4736_v60  ;;  %v3924_v60 = vld [vmem:[#allocation7 + $0xa0] ss:$8 sps:$4 sm:$0xff]  }
 0x118   : > { %1672 = vmatpush1.bf16.msra.mxu1 %v3921_v46 }
 0x119   : > { %944 = vmatmul.mubr.bf16.gmra.mrb[24].mxu0 %v3818_v24  ;;  %1673 = vmatprep.subr.bf16.mxu1 %v3926_v59 }
 0x11a   : > { %953 = vmatprep.mubr.bf16.mxu0 %v3819_v39  ;;  %1325 = vmatpush1.bf16.msra.mxu0 %v4741_v2  ;;  %v3824_v2 = vld [vmem:[#allocation2 + $0x80] ss:$8 sps:$4 sm:$0xff]  }
 0x11b   : > { %1326 = vmatprep.subr.bf16.mxu0 %v4744_v9  ;;  %v3929_v9 = vld [vmem:[#allocation7 + $0xb4] ss:$8 sps:$4 sm:$0xff]   ;;  %1433 = vmatmul.mubr.bf16.gmra.mrb[20].mxu1 %v4653_v57  ;;  %v3933_v57 = vld [vmem:[#allocation7 + $0xd0] ss:$8 sps:$4 sm:$0xff]  }
 0x11c   : > { %1442 = vmatprep.mubr.bf16.mxu1 %v4656_v58  ;;  %1674 = vmatpush1.bf16.msra.mxu1 %v3924_v60  ;;  %v3938_v58 = vld [vmem:[#allocation7 + $0xe4] ss:$8 sps:$4 sm:$0xff]  }
 0x11d   : > { %1675 = vmatprep.subr.bf16.mxu1 %v3929_v9 }
 0x11e   : > { %1327 = vmatpush1.bf16.msra.mxu0 %v4746_v10  ;;  %v3932_v10 = vld [vmem:[#allocation7 + $0xc4] ss:$8 sps:$4 sm:$0xff]  }
 0x11f   : > { %1328 = vmatprep.subr.bf16.mxu0 %v4749_v19  ;;  %v3930_v19 = vld [vmem:[#allocation7 + $0xc0] ss:$8 sps:$4 sm:$0xff]  }
 0x120   : > { %1676 = vmatpush1.bf16.msra.mxu1 %v3927_v52 }
 0x121   : > { %954 = vmatmul.mubr.bf16.gmra.mrb[28].mxu0 %v3821_v47  ;;  %1677 = vmatprep.subr.bf16.mxu1 %v3932_v10 }
 0x122   : > { %963 = vmatprep.mubr.bf16.mxu0 %v3822_v45  ;;  %1329 = vmatpush1.bf16.msra.mxu0 %v4754_v31  ;;  %v3833_v31 = vld [vmem:[#allocation2 + $0x90] ss:$8 sps:$4 sm:$0xff]  }
 0x123   : > { %1330 = vmatprep.subr.bf16.mxu0 %v4757_v20  ;;  %v3840_v20 = vld [vmem:[#allocation2 + $0xa4] ss:$8 sps:$4 sm:$0xff]   ;;  %1443 = vmatmul.mubr.bf16.gmra.mrb[24].mxu1 %v4667_v63  ;;  %v3851_v63 = vld [vmem:[#allocation2 + $0xb0] ss:$8 sps:$4 sm:$0xff]  }
 0x124   : > { %1452 = vmatprep.mubr.bf16.mxu1 %v4671_v1  ;;  %1678 = vmatpush1.bf16.msra.mxu1 %v3930_v19  ;;  %v3939_v1 = vld [vmem:[#allocation7 + $0xf0] ss:$8 sps:$4 sm:$0xff]  }
 0x125   : > { %1679 = vmatprep.subr.bf16.mxu1 %v3935_v33 }
 0x126   : > { %1331 = vmatpush1.bf16.msra.mxu0 %v4762_v38  ;;  %v3842_v38 = vld [vmem:[#allocation2 + $0xa0] ss:$8 sps:$4 sm:$0xff]  }
 0x128   : > { %1680 = vmatpush1.bf16.msra.mxu1 %v3933_v57 }
 0x129   : > { %964 = vmatmul.mubr.bf16.gmra.mrb[32].mxu0 %v3824_v2  ;;  %1681 = vmatprep.subr.bf16.mxu1 %v3938_v58 }
 0x12a   : > { %973 = vmatprep.mubr.bf16.mxu0 %v3831_v51 }
 0x12b   : > { %1453 = vmatmul.mubr.bf16.gmra.mrb[28].mxu1 %v4681_v8  ;;  %v3869_v8 = vld [vmem:[#allocation2 + $0xd0] ss:$8 sps:$4 sm:$0xff]  }
 0x12c   : > { %1462 = vmatprep.mubr.bf16.mxu1 %v4688_v14  ;;  %1682 = vmatpush1.bf16.msra.mxu1 %v3936_v37  ;;  %v3876_v14 = vld [vmem:[#allocation2 + $0xe4] ss:$8 sps:$4 sm:$0xff]  }
 0x12d   : > { %1683 = vmatprep.subr.bf16.mxu1 %v3941_v43 }
 0x130   : > { %1684 = vmatpush1.bf16.msra.mxu1 %v3939_v1 }
 0x131   : > { %974 = vmatmul.mubr.bf16.gmra.mrb[36].mxu0 %v3833_v31 }
 0x132   : > { %983 = vmatprep.mubr.bf16.mxu0 %v3840_v20 }
 0x133   : > { %1463 = vmatmul.mubr.bf16.gmra.mrb[32].mxu1 %v4695_v18  ;;  %v3878_v18 = vld [vmem:[#allocation2 + $0xe0] ss:$8 sps:$4 sm:$0xff]  }
 0x134   : > { %1472 = vmatprep.mubr.bf16.mxu1 %v4702_v25  ;;  %v3887_v25 = vld [vmem:[#allocation2 + $0xf0] ss:$8 sps:$4 sm:$0xff]  }
 0x139   : > { %984 = vmatmul.mubr.bf16.gmra.mrb[40].mxu0 %v3842_v38 }
 0x13a   : > { %993 = vmatprep.mubr.bf16.mxu0 %v3849_v48 }
 0x13b   : > { %1473 = vmatmul.mubr.bf16.gmra.mrb[36].mxu1 %v4709_v29 }
 0x13c   : > { %1482 = vmatprep.mubr.bf16.mxu1 %v4714_v36 }
 0x141   : > { %994 = vmatmul.mubr.bf16.gmra.mrb[44].mxu0 %v3851_v63 }
 0x142   : > { %1003 = vmatprep.mubr.bf16.mxu0 %v3858_v44 }
 0x143   : > { %1483 = vmatmul.mubr.bf16.gmra.mrb[40].mxu1 %v4721_v42 }
 0x149   : > { %1004 = vmatmul.mubr.bf16.gmra.mrb[48].mxu0 %v3860_v54 }
 0x14a   : > { %1013 = vmatprep.mubr.bf16.mxu0 %v3867_v0 }
 0x151   : > { %1014 = vmatmul.mubr.bf16.gmra.mrb[52].mxu0 %v3869_v8 }
 0x152   : > { %1023 = vmatprep.mubr.bf16.mxu0 %v3876_v14 }
 0x159   : > { %1024 = vmatmul.mubr.bf16.gmra.mrb[56].mxu0 %v3878_v18 }
 0x15a   : > { %1033 = vmatprep.mubr.bf16.mxu0 %v3885_v49 }
 0x161   : > { %1034 = vmatmul.mubr.bf16.gmra.mrb[60].mxu0 %v3887_v25 }
 0x162   : > { %1332 = vmatprep.mubr.bf16.mxu0 %v4542_v3 }
 0x169   : > { %1333 = vmatmul.mubr.bf16.vlgmr.msra.gmra.mrb[64].mxu0 %v4544_v4 }
 0x16a   : > { %1342 = vmatprep.mubr.bf16.mxu0 %v4547_v6 }
 0x171   : > { %1343 = vmatmul.mubr.bf16.gmra.mrb[68].mxu0 %v4555_v11 }
 0x172   : > { %1352 = vmatprep.mubr.bf16.mxu0 %v4558_v13 }
 0x179   : > { %1353 = vmatmul.mubr.bf16.gmra.mrb[72].mxu0 %v4563_v16 }
 0x17a   : > { %1362 = vmatprep.mubr.bf16.mxu0 %v4566_v17 }
 0x181   : > { %1363 = vmatmul.mubr.bf16.gmra.mrb[76].mxu0 %v4571_v21 }
 0x182   : > { %1372 = vmatprep.mubr.bf16.mxu0 %v4574_v22 }
 0x189   : > { %1373 = vmatmul.mubr.bf16.gmra.mrb[80].mxu0 %v4577_v23 }
 0x1bc   : > { %v885_v29 = vpop.f32.mrb[0].mxu0 }
 0x1bd   : > { %v887_v3 = vpop.f32.mrb[1].mxu0 }
 0x1be   : > { %v889_v36 = vpop.f32.mrb[2].mxu0 }
 0x1bf   : > { %v1044_v4 = vpack.c.bf16 %v889_v36, %v885_v29  ;;  %v891_v42 = vpop.f32.mrb[3].mxu0 }
 0x1c0   : > { %v1045_v6 = vpack.c.bf16 %v891_v42, %v887_v3 }
 0x1c2   : > { %1685 = vmatprep.mubr.bf16.mxu1 %v1045_v6 }
 0x1c3   : > { %1686 = vmatmul.mubr.bf16.vlgmr.msra.gmra.mrb[44].mxu1 %v1044_v4 }
 0x1c4   : > { %v895_v11 = vpop.f32.mrb[4].mxu0 }
 0x1c5   : > { %v897_v13 = vpop.f32.mrb[5].mxu0 }
 0x1c6   : > { %v899_v50 = vpop.f32.mrb[6].mxu0 }
 0x1c7   : > { %v1046_v16 = vpack.c.bf16 %v899_v50, %v895_v11  ;;  %v901_v55 = vpop.f32.mrb[7].mxu0 }
 0x1c8   : > { %v1047_v17 = vpack.c.bf16 %v901_v55, %v897_v13 }
 0x1ca   : > { %1695 = vmatprep.mubr.bf16.mxu1 %v1047_v17 }
 0x1cb   : > { %1696 = vmatmul.mubr.bf16.gmra.mrb[48].mxu1 %v1046_v16 }
 0x1cc   : > { %v905_v21 = vpop.f32.mrb[8].mxu0 }
 0x1cd   : > { %v907_v22 = vpop.f32.mrb[9].mxu0 }
 0x1ce   : > { %v909_v56 = vpop.f32.mrb[10].mxu0 }
 0x1cf   : > { %v1048_v23 = vpack.c.bf16 %v909_v56, %v905_v21  ;;  %v911_v61 = vpop.f32.mrb[11].mxu0 }
 0x1d0   : > { %v1049_v30 = vpack.c.bf16 %v911_v61, %v907_v22 }
 0x1d2   : > { %1705 = vmatprep.mubr.bf16.mxu1 %v1049_v30 }
 0x1d3   : > { %1706 = vmatmul.mubr.bf16.gmra.mrb[52].mxu1 %v1048_v23 }
 0x1d4   : > { %v915_v26 = vpop.f32.mrb[12].mxu0 }
 0x1d5   : > { %v917_v27 = vpop.f32.mrb[13].mxu0 }
 0x1d6   : > { %v919_v62 = vpop.f32.mrb[14].mxu0 }
 0x1d7   : > { %v1050_v5 = vpack.c.bf16 %v919_v62, %v915_v26  ;;  %v921_v7 = vpop.f32.mrb[15].mxu0 }
 0x1d8   : > { %v1051_v32 = vpack.c.bf16 %v921_v7, %v917_v27 }
 0x1da   : > { %1715 = vmatprep.mubr.bf16.mxu1 %v1051_v32 }
 0x1db   : > { %1716 = vmatmul.mubr.bf16.gmra.mrb[56].mxu1 %v1050_v5 }
 0x1dc   : > { %v925_v34 = vpop.f32.mrb[16].mxu0 }
 0x1dd   : > { %v927_v12 = vpop.f32.mrb[17].mxu0 }
 0x1de   : > { %v929_v15 = vpop.f32.mrb[18].mxu0 }
 0x1df   : > { %v1052_v24 = vpack.c.bf16 %v929_v15, %v925_v34  ;;  %v931_v28 = vpop.f32.mrb[19].mxu0 }
 0x1e0   : > { %v1053_v39 = vpack.c.bf16 %v931_v28, %v927_v12 }
 0x1e2   : > { %1725 = vmatprep.mubr.bf16.mxu1 %v1053_v39 }
 0x1e3   : > { %1726 = vmatmul.mubr.bf16.gmra.mrb[60].mxu1 %v1052_v24 }
 0x1e4   : > { %v935_v40 = vpop.f32.mrb[20].mxu0 }
 0x1e5   : > { %v937_v35 = vpop.f32.mrb[21].mxu0 }
 0x1e6   : > { %v939_v41 = vpop.f32.mrb[22].mxu0 }
 0x1e7   : > { %v1054_v47 = vpack.c.bf16 %v939_v41, %v935_v40  ;;  %v941_v53 = vpop.f32.mrb[23].mxu0 }
 0x1e8   : > { %v1055_v45 = vpack.c.bf16 %v941_v53, %v937_v35 }
 0x1ea   : > { %1735 = vmatprep.mubr.bf16.mxu1 %v1055_v45 }
 0x1eb   : > { %1736 = vmatmul.mubr.bf16.gmra.mrb[0].mxu1 %v1054_v47 }
 0x1ec   : > { %v945_v46 = vpop.f32.mrb[24].mxu0 }
 0x1ed   : > { %v947_v59 = vpop.f32.mrb[25].mxu0 }
 0x1ee   : > { %v949_v60 = vpop.f32.mrb[26].mxu0 }
 0x1ef   : > { %v1056_v2 = vpack.c.bf16 %v949_v60, %v945_v46  ;;  %v951_v9 = vpop.f32.mrb[27].mxu0 }
 0x1f0   : > { %v1057_v51 = vpack.c.bf16 %v951_v9, %v947_v59 }
 0x1f2   : > { %1745 = vmatprep.mubr.bf16.mxu1 %v1057_v51 }
 0x1f3   : > { %1746 = vmatmul.mubr.bf16.gmra.mrb[4].mxu1 %v1056_v2 }
 0x1f4   : > { %v955_v52 = vpop.f32.mrb[28].mxu0 }
 0x1f5   : > { %v957_v10 = vpop.f32.mrb[29].mxu0 }
 0x1f6   : > { %v959_v19 = vpop.f32.mrb[30].mxu0 }
 0x1f7   : > { %v1058_v31 = vpack.c.bf16 %v959_v19, %v955_v52  ;;  %v961_v33 = vpop.f32.mrb[31].mxu0 }
 0x1f8   : > { %v1059_v20 = vpack.c.bf16 %v961_v33, %v957_v10 }
 0x1fa   : > { %1755 = vmatprep.mubr.bf16.mxu1 %v1059_v20 }
 0x1fb   : > { %1756 = vmatmul.mubr.bf16.gmra.mrb[8].mxu1 %v1058_v31 }
 0x1fc   : > { %v965_v57 = vpop.f32.mrb[32].mxu0 }
 0x1fd   : > { %v967_v58 = vpop.f32.mrb[33].mxu0 }
 0x1fe   : > { %v969_v37 = vpop.f32.mrb[34].mxu0 }
 0x1ff   : > { %v1060_v38 = vpack.c.bf16 %v969_v37, %v965_v57  ;;  %v971_v48 = vpop.f32.mrb[35].mxu0 }
 0x200   : > { %v1061_v63 = vpack.c.bf16 %v971_v48, %v967_v58  ;;  %v3942_v48 = vld [vmem:[#allocation10 + $0x40] sm:$0xff]  }
 0x201   : > { %3507 = vmatprep.subr.bf16.mxu0 %v3942_v48  ;;  %v4906_v48 = vld [vmem:[%s4525_s28 + $0x38] sm:$0xff] }
 0x202   : > { %1765 = vmatprep.mubr.bf16.mxu1 %v1061_v63  ;;  %v3943_v63 = vld [vmem:[#allocation10] sm:$0xff]  }
 0x203   : > { %1766 = vmatmul.mubr.bf16.gmra.mrb[12].mxu1 %v1060_v38  ;;  %3508 = vmatpush3.bf16.msra.mxu0 %v3943_v63 }
 0x204   : > { %v975_v1 = vpop.f32.mrb[36].mxu0 }
 0x205   : > { %v977_v43 = vpop.f32.mrb[37].mxu0 }
 0x206   : > { %v979_v44 = vpop.f32.mrb[38].mxu0 }
 0x207   : > { %v1062_v54 = vpack.c.bf16 %v979_v44, %v975_v1  ;;  %v981_v0 = vpop.f32.mrb[39].mxu0  ;;  %v3944_v1 = vld [vmem:[#allocation10 + $0x48] sm:$0xff]   ;;  %v3946_v44 = vld [vmem:[#allocation10 + $0x50] sm:$0xff]  }
 0x208   : > { %v1063_v8 = vpack.c.bf16 %v981_v0, %v977_v43  ;;  %v3945_v43 = vld [vmem:[#allocation10 + $0x8] sm:$0xff]   ;;  %3509 = vmatprep.subr.bf16.mxu0 %v3944_v1  ;;  %v3948_v0 = vld [vmem:[#allocation10 + $0x58] sm:$0xff]  }
 0x209   : > { %3510 = vmatpush3.bf16.msra.mxu0 %v3945_v43  ;;  %v4911_v43 = vld [vmem:[%s4525_s28 + $0x40] sm:$0xff]  ;;  %v4963_v1 = vld [vmem:[%s4525_s28 + $0x88] sm:$0xff] }
 0x20a   : > { %1775 = vmatprep.mubr.bf16.mxu1 %v1063_v8  ;;  %3511 = vmatprep.subr.bf16.mxu0 %v3946_v44  ;;  %v3949_v8 = vld [vmem:[#allocation10 + $0x18] sm:$0xff]  }
 0x20b   : > { %1776 = vmatmul.mubr.bf16.gmra.mrb[16].mxu1 %v1062_v54  ;;  %v3947_v54 = vld [vmem:[#allocation10 + $0x10] sm:$0xff]   ;;  %v4950_v44 = vld [vmem:[%s4525_s28 + $0x78] sm:$0xff] }
 0x20c   : > { %v985_v14 = vpop.f32.mrb[40].mxu0 }
 0x20d   : > { %v987_v18 = vpop.f32.mrb[41].mxu0  ;;  %3512 = vmatpush3.bf16.msra.mxu0 %v3947_v54 }
 0x20e   : > { %v989_v49 = vpop.f32.mrb[42].mxu0  ;;  %3513 = vmatprep.subr.bf16.mxu0 %v3948_v0  ;;  %v4916_v0 = vld [vmem:[%s4525_s28 + $0x48] sm:$0xff] }
 0x20f   : > { %v1064_v25 = vpack.c.bf16 %v989_v49, %v985_v14  ;;  %v991_v29 = vpop.f32.mrb[43].mxu0  ;;  %v3950_v14 = vld [vmem:[#allocation10 + $0x60] sm:$0xff]   ;;  %v3952_v49 = vld [vmem:[#allocation10 + $0x68] sm:$0xff]  }
 0x210   : > { %v1065_v3 = vpack.c.bf16 %v991_v29, %v987_v18  ;;  %v3951_v18 = vld [vmem:[#allocation10 + $0x20] sm:$0xff]   ;;  %v1848_v29 = vlaneseq }
 0x211   : > { %3514 = vmatpush3.bf16.msra.mxu0 %v3949_v8 }
 0x212   : > { %1785 = vmatprep.mubr.bf16.mxu1 %v1065_v3  ;;  %3515 = vmatprep.subr.bf16.mxu0 %v3950_v14  ;;  %v3954_v3 = vld [vmem:[#allocation10 + $0x70] sm:$0xff]   ;;  %v4937_v14 = vld [vmem:[%s4525_s28 + $0x68] sm:$0xff] }
 0x213   : > { %1786 = vmatmul.mubr.bf16.gmra.mrb[20].mxu1 %v1064_v25  ;;  %v3953_v25 = vld [vmem:[#allocation10 + $0x28] sm:$0xff]  }
 0x214   : > { %v995_v36 = vpop.f32.mrb[44].mxu0 }
 0x215   : > { %v997_v4 = vpop.f32.mrb[45].mxu0  ;;  %3516 = vmatpush3.bf16.msra.mxu0 %v3951_v18 }
 0x216   : > { %v999_v42 = vpop.f32.mrb[46].mxu0  ;;  %3517 = vmatprep.subr.bf16.mxu0 %v3952_v49  ;;  %v4921_v49 = vld [vmem:[%s4525_s28 + $0x50] sm:$0xff] }
 0x217   : > { %v1066_v6 = vpack.c.bf16 %v999_v42, %v995_v36  ;;  %v1001_v11 = vpop.f32.mrb[47].mxu0  ;;  %v3955_v36 = vld [vmem:[#allocation10 + $0x30] sm:$0xff]  }
 0x218   : > { %v1067_v13 = vpack.c.bf16 %v1001_v11, %v997_v4  ;;  %v1849_v4 = vshrl.u32 %v1848_v29, 7  ;;  %v1846_v11 = vld [vmem:[%s5579_s4] sm:$0x3] }
 0x219   : > { %3518 = vmatpush3.bf16.msra.mxu0 %v3953_v25  ;;  %v4943_v25 = vld [vmem:[%s4525_s28 + $0x70] sm:$0xff] }
 0x21a   : > { %1795 = vmatprep.mubr.bf16.mxu1 %v1067_v13  ;;  %3519 = vmatprep.subr.bf16.mxu0 %v3954_v3  ;;  %v1850_v42 = vsub.s32 0, %v1849_v4  ;;  %v4926_v3 = vld [vmem:[%s4525_s28 + $0x58] sm:$0xff] }
 0x21b   : > { %1796 = vmatmul.mubr.bf16.gmra.mrb[24].mxu1 %v1066_v6  ;;  %v1854_v6 = vsub.s32 1, %v1849_v4 }
 0x21c   : > { %v1005_v50 = vpop.f32.mrb[48].mxu0  ;;  %v4866_v13 = vrot.slane %v1846_v11, %v1850_v42 }
 0x21d   : > { %v1007_v16 = vpop.f32.mrb[49].mxu0  ;;  %3520 = vmatpush3.bf16.msra.mxu0 %v3955_v36 }
 0x21e   : > { %v1009_v55 = vpop.f32.mrb[50].mxu0 }
 0x21f   : > { %v1068_v17 = vpack.c.bf16 %v1009_v55, %v1005_v50  ;;  %v1011_v21 = vpop.f32.mrb[51].mxu0  ;;  %v4868_v50 = vrot.slane %v1846_v11, %v1854_v6  ;;  %v4871_v55 = vld [vmem:[%s4525_s28] sm:$0xff] }
 0x220   : > { %v1069_v22 = vpack.c.bf16 %v1011_v21, %v1007_v16  ;;  %v3956_v16 = vld [vmem:[#allocation10 + $0x78] sm:$0xff]   ;;  %v1987_v21 = vunpack.c.h.bf16 %v4871_v55  ;;  %v4932_v11 = vld [vmem:[%s4525_s28 + $0x60] sm:$0xff] }
 0x221   : > { %3521 = vmatprep.subr.bf16.mxu0 %v3956_v16 }
 0x222   : > { %1805 = vmatprep.mubr.bf16.mxu1 %v1069_v22  ;;  %v4876_v22 = vld [vmem:[%s4525_s28 + $0x8] sm:$0xff] }
 0x223   : > { %1806 = vmatmul.mubr.bf16.gmra.mrb[28].mxu1 %v1068_v17  ;;  %v1986_v17 = vunpack.c.l.bf16 %v4871_v55 }
 0x224   : > { %v1015_v56 = vpop.f32.mrb[52].mxu0 }
 0x225   : > { %v1017_v23 = vpop.f32.mrb[53].mxu0 }
 0x226   : > { %v1019_v61 = vpop.f32.mrb[54].mxu0 }
 0x227   : > { %v1070_v30 = vpack.c.bf16 %v1019_v61, %v1015_v56  ;;  %v1021_v26 = vpop.f32.mrb[55].mxu0  ;;  %v1988_v56 = vunpack.c.l.bf16 %v4876_v22  ;;  %v3957_v61 = vld [vmem:[#allocation10 + $0x38] sm:$0xff]  }
 0x228   : > { %v1071_v27 = vpack.c.bf16 %v1021_v26, %v1017_v23  ;;  %v1989_v23 = vunpack.c.h.bf16 %v4876_v22  ;;  %3522 = vmatpush3.bf16.msra.mxu0 %v3957_v61 }
 0x22a   : > { %1815 = vmatprep.mubr.bf16.mxu1 %v1071_v27 }
 0x22b   : > { %1816 = vmatmul.mubr.bf16.gmra.mrb[32].mxu1 %v1070_v30  ;;  %v4881_v30 = vld [vmem:[%s4525_s28 + $0x10] sm:$0xff] }
 0x22c   : > { %v1025_v62 = vpop.f32.mrb[56].mxu0  ;;  %v1990_v26 = vunpack.c.l.bf16 %v4881_v30  ;;  %v1991_v27 = vunpack.c.h.bf16 %v4881_v30 }
 0x22d   : > { %v1027_v5 = vpop.f32.mrb[57].mxu0 }
 0x22e   : > { %v1029_v7 = vpop.f32.mrb[58].mxu0 }
 0x22f   : > { %v1072_v32 = vpack.c.bf16 %v1029_v7, %v1025_v62  ;;  %v1031_v34 = vpop.f32.mrb[59].mxu0  ;;  %v4886_v62 = vld [vmem:[%s4525_s28 + $0x18] sm:$0xff] }
 0x230   : > { %v1073_v12 = vpack.c.bf16 %v1031_v34, %v1027_v5  ;;  %v1992_v5 = vunpack.c.l.bf16 %v4886_v62 }
 0x232   : > { %1825 = vmatprep.mubr.bf16.mxu1 %v1073_v12 }
 0x233   : > { %1826 = vmatmul.mubr.bf16.gmra.mrb[36].mxu1 %v1072_v32  ;;  %v4891_v32 = vld [vmem:[%s4525_s28 + $0x20] sm:$0xff] }
 0x234   : > { %v1035_v15 = vpop.f32.mrb[60].mxu0 }
 0x235   : > { %v1037_v24 = vpop.f32.mrb[61].mxu0 }
 0x236   : > { %v1039_v28 = vpop.f32.mrb[62].mxu0 }
 0x237   : > { %v1074_v39 = vpack.c.bf16 %v1039_v28, %v1035_v15  ;;  %v1041_v40 = vpop.f32.mrb[63].mxu0  ;;  %v4896_v15 = vld [vmem:[%s4525_s28 + $0x28] sm:$0xff] }
 0x238   : > { %v1075_v35 = vpack.c.bf16 %v1041_v40, %v1037_v24  ;;  %v4983_v40 = vld [vmem:[%s4525_s28 + $0xa0] sm:$0xff] }
 0x239   : > { %5621 = vst [vmem:[#allocation20_spill] sm:$0xff] %v4983_v40 }
 0x23a   : > { %1835 = vmatprep.mubr.bf16.mxu1 %v1075_v35 }
 0x23b   : > { %1836 = vmatmul.mubr.bf16.gmra.mrb[40].mxu1 %v1074_v39  ;;  %v4901_v39 = vld [vmem:[%s4525_s28 + $0x30] sm:$0xff] }
 0x23c   : > { %v4823_v41 = vpop.f32.mrb[64].mxu0 }
 0x23d   : > { %v4825_v47 = vpop.f32.mrb[65].mxu0 }
 0x23e   : > { %v4827_v53 = vpop.f32.mrb[66].mxu0 }
 0x23f   : > { %v4829_v45 = vpop.f32.mrb[67].mxu0 }
 0x244   : > { %v4831_v46 = vpop.f32.mrb[68].mxu0 }
 0x245   : > { %v4833_v59 = vpop.f32.mrb[69].mxu0 }
 0x246   : > { %v4835_v60 = vpop.f32.mrb[70].mxu0 }
 0x247   : > { %v4837_v2 = vpop.f32.mrb[71].mxu0 }
 0x24c   : > { %v4839_v9 = vpop.f32.mrb[72].mxu0 }
 0x24d   : > { %v4841_v51 = vpop.f32.mrb[73].mxu0 }
 0x24e   : > { %v4843_v52 = vpop.f32.mrb[74].mxu0 }
 0x24f   : > { %v4845_v10 = vpop.f32.mrb[75].mxu0 }
 0x254   : > { %v4847_v19 = vpop.f32.mrb[76].mxu0 }
 0x255   : > { %v4849_v31 = vpop.f32.mrb[77].mxu0 }
 0x256   : > { %v4851_v33 = vpop.f32.mrb[78].mxu0 }
 0x257   : > { %v4853_v20 = vpop.f32.mrb[79].mxu0 }
 0x25c   : > { %v4855_v57 = vpop.f32.mrb[80].mxu0 }
 0x25d   : > { %v4857_v58 = vpop.f32.mrb[81].mxu0 }
 0x25e   : > { %v4859_v37 = vpop.f32.mrb[82].mxu0 }
 0x25f   : > { %v4861_v38 = vpop.f32.mrb[83].mxu0 }
 0x296   : > { %v1687_v18 = vpop.f32.mrb[44].mxu1 }
 0x297   : > { %v1688_v42 = vadd.f32 %v1687_v18, %v4823_v41  ;;  %v1689_v6 = vpop.f32.mrb[45].mxu1  ;;  %v4957_v41 = vld [vmem:[%s4525_s28 + $0x80] sm:$0xff] }
 0x298   : > { %v1690_v8 = vadd.f32 %v1689_v6, %v4825_v47  ;;  %v1691_v36 = vpop.f32.mrb[46].mxu1  ;;  %v4991_v47 = vld [vmem:[%s4525_s28 + $0xa8] sm:$0xff] }
 0x299   : > { %v1858_v16 = vadd.f32 %v4866_v13, %v1688_v42  ;;  %v1692_v61 = vadd.f32 %v1691_v36, %v4827_v53  ;;  %v1693_v54 = vpop.f32.mrb[47].mxu1  ;;  %v4976_v42 = vld [vmem:[%s4525_s28 + $0x98] sm:$0xff]  ;;  %5622 = vst [vmem:[#allocation21_spill] sm:$0xff] %v4991_v47 }
 0x29a   : > { %v1859_v4 = vadd.f32 %v4868_v50, %v1690_v8  ;;  %v1694_v29 = vadd.f32 %v1693_v54, %v4829_v45  ;;  %v4969_v54 = vld [vmem:[%s4525_s28 + $0x90] sm:$0xff]  ;;  %5620 = vst [vmem:[#allocation19_spill] sm:$0xff] %v4976_v42 }
 0x29b   : > { %v1922_v53 = vmax.f32 %v1858_v16, 0.0  ;;  %v1860_v36 = vadd.f32 %v4866_v13, %v1692_v61 }
 0x29c   : > { %v1923_v8 = vmax.f32 %v1859_v4, 0.0  ;;  %v1861_v45 = vadd.f32 %v4868_v50, %v1694_v29 }
 0x29d   : > { %v2050_v16 = vadd.f32 %v1986_v17, %v1922_v53  ;;  %v1924_v61 = vmax.f32 %v1860_v36, 0.0 }
 0x29e   : > { %v2051_v29 = vadd.f32 %v1987_v21, %v1923_v8  ;;  %v1925_v4 = vmax.f32 %v1861_v45, 0.0  ;;  %v1697_v35 = vpop.f32.mrb[48].mxu1 }
 0x29f   : > { %v2114_v28 = vrot.slane %v2050_v16, 4  ;;  %v2052_v17 = vadd.f32 %v1988_v56, %v1924_v61  ;;  %v1698_v53 = vadd.f32 %v1697_v35, %v4831_v46  ;;  %v1699_v36 = vpop.f32.mrb[49].mxu1 }
 0x2a0   : > { %v2120_v21 = vrot.slane %v2051_v29, 4  ;;  %v2053_v8 = vadd.f32 %v1989_v23, %v1925_v4  ;;  %v1700_v45 = vadd.f32 %v1699_v36, %v4833_v59  ;;  %v1701_v18 = vpop.f32.mrb[50].mxu1 }
 0x2a1   : > { %v2115_v6 = vadd.f32 %v2114_v28, %v2050_v16  ;;  %v2126_v24 = vrot.slane %v2052_v17, 4  ;;  %v1862_v56 = vadd.f32 %v4866_v13, %v1698_v53  ;;  %v1702_v46 = vadd.f32 %v1701_v18, %v4835_v60  ;;  %v1703_v35 = vpop.f32.mrb[51].mxu1 }
 0x2a2   : > { %v2121_v61 = vadd.f32 %v2120_v21, %v2051_v29  ;;  %v2132_v12 = vrot.slane %v2053_v8, 4  ;;  %v1863_v55 = vadd.f32 %v4868_v50, %v1700_v45  ;;  %v1704_v34 = vadd.f32 %v1703_v35, %v4837_v2 }
 0x2a3   : > { %v2116_v22 = vrot.slane %v2115_v6, 2  ;;  %v2127_v23 = vadd.f32 %v2126_v24, %v2052_v17  ;;  %v1926_v4 = vmax.f32 %v1862_v56, 0.0  ;;  %v1864_v59 = vadd.f32 %v4866_v13, %v1702_v46 }
 0x2a4   : > { %v2122_v36 = vrot.slane %v2121_v61, 2  ;;  %v2133_v63 = vadd.f32 %v2132_v12, %v2053_v8  ;;  %v1927_v28 = vmax.f32 %v1863_v55, 0.0  ;;  %v1865_v16 = vadd.f32 %v4868_v50, %v1704_v34 }
 0x2a5   : > { %v2117_v53 = vadd.f32 %v2116_v22, %v2115_v6  ;;  %v2128_v7 = vrot.slane %v2127_v23, 2  ;;  %v2054_v60 = vadd.f32 %v1990_v26, %v1926_v4  ;;  %v1928_v18 = vmax.f32 %v1864_v59, 0.0 }
 0x2a6   : > { %v2123_v29 = vadd.f32 %v2122_v36, %v2121_v61  ;;  %v2134_v21 = vrot.slane %v2133_v63, 2  ;;  %v2055_v2 = vadd.f32 %v1991_v27, %v1927_v28  ;;  %v1929_v24 = vmax.f32 %v1865_v16, 0.0  ;;  %v1707_v17 = vpop.f32.mrb[52].mxu1 }
 0x2a7   : > { %v2118_v45 = vrot.slane %v2117_v53, 1  ;;  %v2129_v56 = vadd.f32 %v2128_v7, %v2127_v23  ;;  %v2138_v12 = vrot.slane %v2054_v60, 4  ;;  %v2056_v34 = vadd.f32 %v1992_v5, %v1928_v18  ;;  %v1709_v6 = vpop.f32.mrb[53].mxu1 }
 0x2a8   : > { %v2124_v55 = vrot.slane %v2123_v29, 1  ;;  %v2135_v8 = vadd.f32 %v2134_v21, %v2133_v63  ;;  %v2144_v46 = vrot.slane %v2055_v2, 4  ;;  %v5623_v26 = vunpack.c.h.bf16 %v4886_v62  ;;  %v1711_v61 = vpop.f32.mrb[54].mxu1 }
 0x2a9   : > { %v2119_v22 = vadd.f32 %v2118_v45, %v2117_v53  ;;  %v2130_v4 = vrot.slane %v2129_v56, 1  ;;  %v2139_v30 = vadd.f32 %v2138_v12, %v2054_v60  ;;  %v2150_v27 = vrot.slane %v2056_v34, 4  ;;  %v1713_v59 = vpop.f32.mrb[55].mxu1 }
 0x2aa   : > { %v2057_v35 = vadd.f32 %v5623_v26, %v1929_v24  ;;  %v2125_v36 = vadd.f32 %v2124_v55, %v2123_v29  ;;  %v2136_v28 = vrot.slane %v2135_v8, 1  ;;  %v2145_v7 = vadd.f32 %v2144_v46, %v2055_v2 }
 0x2ab   : > { %v2498_v16 = vpack.c.bf16 %v2119_v22, %v2119_v22  ;;  %v2131_v47 = vadd.f32 %v2130_v4, %v2129_v56  ;;  %v2140_v5 = vrot.slane %v2139_v30, 2  ;;  %v2151_v18 = vadd.f32 %v2150_v27, %v2056_v34 }
 0x2ac   : > { %v2156_v23 = vrot.slane %v2057_v35, 4  ;;  %v2499_v40 = vpack.c.bf16 %v2125_v36, %v2125_v36  ;;  %v2137_v63 = vadd.f32 %v2136_v28, %v2135_v8  ;;  %v2146_v21 = vrot.slane %v2145_v7, 2 }
 0x2ad   : > { %v2665_v24 = vunpack.c.l.b16 %v2498_v16  ;;  %v2500_v26 = vpack.c.bf16 %v2131_v47, %v2131_v47  ;;  %v2141_v53 = vadd.f32 %v2140_v5, %v2139_v30  ;;  %v2152_v45 = vrot.slane %v2151_v18, 2 }
 0x2ae   : > { %v2157_v62 = vadd.f32 %v2156_v23, %v2057_v35  ;;  %v2666_v60 = vunpack.c.l.b16 %v2499_v40  ;;  %v2501_v12 = vpack.c.bf16 %v2137_v63, %v2137_v63  ;;  %v2147_v42 = vadd.f32 %v2146_v21, %v2145_v7  ;;  %v1717_v2 = vpop.f32.mrb[56].mxu1 }
 0x2af   : > { %v2667_v55 = vunpack.c.l.b16 %v2500_v26  ;;  %v2142_v46 = vrot.slane %v2141_v53, 1  ;;  %v2153_v56 = vadd.f32 %v2152_v45, %v2151_v18  ;;  %v1708_v34 = vadd.f32 %v1707_v17, %v4839_v9  ;;  %v1719_v22 = vpop.f32.mrb[57].mxu1 }
 0x2b0   : > { %v2158_v29 = vrot.slane %v2157_v62, 2  ;;  %v2668_v8 = vunpack.c.l.b16 %v2501_v12  ;;  %v2148_v4 = vrot.slane %v2147_v42, 1  ;;  %v1710_v35 = vadd.f32 %v1709_v6, %v4841_v51  ;;  %v1721_v47 = vpop.f32.mrb[58].mxu1 }
 0x2b1   : > { %v2730_v30 = vsel %vm2729_vm0, %v2667_v55, %v2665_v24  ;;  %v2143_v40 = vadd.f32 %v2142_v46, %v2141_v53  ;;  %v2154_v36 = vrot.slane %v2153_v56, 1  ;;  %v1866_v28 = vadd.f32 %v4866_v13, %v1708_v34  ;;  %v1723_v7 = vpop.f32.mrb[59].mxu1 }
 0x2b2   : > { %v2159_v27 = vadd.f32 %v2158_v29, %v2157_v62  ;;  %v5017_v23 = vsel %vm2729_vm0, %v2668_v8, %v2666_v60  ;;  %v2149_v16 = vadd.f32 %v2148_v4, %v2147_v42  ;;  %v1867_v9 = vadd.f32 %v4868_v50, %v1710_v35 }
 0x2b3   : > { %v2502_v17 = vpack.c.bf16 %v2143_v40, %v2143_v40  ;;  %v2155_v18 = vadd.f32 %v2154_v36, %v2153_v56  ;;  %v1930_v63 = vmax.f32 %v1866_v28, 0.0  ;;  %v1712_v51 = vadd.f32 %v1711_v61, %v4843_v52 }
 0x2b4   : > { %v2160_v5 = vrot.slane %v2159_v27, 1  ;;  %v2503_v6 = vpack.c.bf16 %v2149_v16, %v2149_v16  ;;  %v1931_v62 = vmax.f32 %v1867_v9, 0.0  ;;  %v1714_v24 = vadd.f32 %v1713_v59, %v4845_v10 }
 0x2b5   : > { %v2669_v26 = vunpack.c.l.b16 %v2502_v17  ;;  %v2504_v53 = vpack.c.bf16 %v2155_v18, %v2155_v18  ;;  %v5624_v45 = vunpack.c.l.bf16 %v4891_v32  ;;  %v1868_v42 = vadd.f32 %v4866_v13, %v1712_v51 }
 0x2b6   : > { %v2161_v21 = vadd.f32 %v2160_v5, %v2159_v27  ;;  %v5025_v12 = vunpack.c.l.b16 %v2503_v6  ;;  %v5625_v55 = vunpack.c.h.bf16 %v4891_v32  ;;  %v1869_v52 = vadd.f32 %v4868_v50, %v1714_v24  ;;  %v5030_v61 = vpop.f32.mrb[60].mxu1 }
 0x2b7   : > { %v2058_v60 = vadd.f32 %v5624_v45, %v1930_v63  ;;  %v2732_v56 = vsel %vm2731_vm1, %v2669_v26, %v2730_v30  ;;  %v2671_v10 = vunpack.c.l.b16 %v2504_v53  ;;  %v1932_v34 = vmax.f32 %v1868_v42, 0.0  ;;  %v5033_v8 = vpop.f32.mrb[61].mxu1 }
 0x2b8   : > { %v2505_v29 = vpack.c.bf16 %v2161_v21, %v2161_v21  ;;  %v2059_v46 = vadd.f32 %v5625_v55, %v1931_v62  ;;  %v1933_v35 = vmax.f32 %v1869_v52, 0.0  ;;  %v1718_v40 = vadd.f32 %v1717_v2, %v4847_v19  ;;  %v5038_v36 = vpop.f32.mrb[62].mxu1 }
 0x2b9   : > { %v2162_v59 = vrot.slane %v2058_v60, 4  ;;  %v5041_v32 = vsel %vm2733_vm2, %v2671_v10, %v2732_v56  ;;  %v5626_v16 = vunpack.c.l.bf16 %v4896_v15  ;;  %v1720_v5 = vadd.f32 %v1719_v22, %v4849_v31  ;;  %v5046_v9 = vpop.f32.mrb[63].mxu1 }
 0x2ba   : > { %v5035_v4 = vunpack.c.l.b16 %v2505_v29  ;;  %v2168_v27 = vrot.slane %v2059_v46, 4  ;;  %v5627_v18 = vunpack.c.h.bf16 %v4896_v15  ;;  %v1870_v51 = vadd.f32 %v4866_v13, %v1718_v40 }
 0x2bb   : > { %v2163_v28 = vadd.f32 %v2162_v59, %v2058_v60  ;;  %v2060_v30 = vadd.f32 %v5626_v16, %v1932_v34  ;;  %v1722_v19 = vadd.f32 %v1721_v47, %v4851_v33  ;;  %v1871_v21 = vadd.f32 %v4868_v50, %v1720_v5 }
 0x2bc   : > { %v2169_v17 = vadd.f32 %v2168_v27, %v2059_v46  ;;  %v2061_v63 = vadd.f32 %v5627_v18, %v1933_v35  ;;  %v1724_v62 = vadd.f32 %v1723_v7, %v4853_v20  ;;  %v1934_v31 = vmax.f32 %v1870_v51, 0.0 }
 0x2bd   : > { %v2164_v2 = vrot.slane %v2163_v28, 2  ;;  %v2174_v6 = vrot.slane %v2060_v30, 4  ;;  %v1872_v22 = vadd.f32 %v4866_v13, %v1722_v19  ;;  %v1935_v15 = vmax.f32 %v1871_v21, 0.0 }
 0x2be   : > { %v2170_v24 = vrot.slane %v2169_v17, 2  ;;  %v2180_v26 = vrot.slane %v2061_v63, 4  ;;  %v1873_v60 = vadd.f32 %v4868_v50, %v1724_v62  ;;  %v5628_v33 = vunpack.c.l.bf16 %v4901_v39  ;;  %v5058_v46 = vpop.f32.mrb[0].mxu1 }
 0x2bf   : > { %v2165_v53 = vadd.f32 %v2164_v2, %v2163_v28  ;;  %v2175_v45 = vadd.f32 %v2174_v6, %v2060_v30  ;;  %v1936_v55 = vmax.f32 %v1872_v22, 0.0  ;;  %v5629_v52 = vunpack.c.h.bf16 %v4901_v39  ;;  %v5062_v59 = vpop.f32.mrb[1].mxu1 }
 0x2c0   : > { %v2171_v42 = vadd.f32 %v2170_v24, %v2169_v17  ;;  %v2181_v29 = vadd.f32 %v2180_v26, %v2061_v63  ;;  %v2062_v47 = vadd.f32 %v5628_v33, %v1934_v31  ;;  %v1937_v10 = vmax.f32 %v1873_v60, 0.0  ;;  %v5066_v16 = vpop.f32.mrb[2].mxu1 }
 0x2c1   : > { %v2166_v20 = vrot.slane %v2165_v53, 1  ;;  %v2176_v7 = vrot.slane %v2175_v45, 2  ;;  %v2063_v56 = vadd.f32 %v5629_v52, %v1935_v15  ;;  %v5630_v40 = vunpack.c.l.bf16 %v4906_v48  ;;  %v5070_v39 = vpop.f32.mrb[3].mxu1 }
 0x2c2   : > { %v2172_v34 = vrot.slane %v2171_v42, 1  ;;  %v2182_v27 = vrot.slane %v2181_v29, 2  ;;  %v2186_v35 = vrot.slane %v2062_v47, 4  ;;  %v5631_v18 = vunpack.c.h.bf16 %v4906_v48 }
 0x2c3   : > { %v2064_v28 = vadd.f32 %v5630_v40, %v1936_v55  ;;  %v2167_v30 = vadd.f32 %v2166_v20, %v2165_v53  ;;  %v2177_v5 = vadd.f32 %v2176_v7, %v2175_v45  ;;  %v2192_v17 = vrot.slane %v2063_v56, 4 }
 0x2c4   : > { %v2065_v63 = vadd.f32 %v5631_v18, %v1937_v10  ;;  %v2173_v51 = vadd.f32 %v2172_v34, %v2171_v42  ;;  %v2183_v19 = vadd.f32 %v2182_v27, %v2181_v29  ;;  %v2187_v2 = vadd.f32 %v2186_v35, %v2062_v47 }
 0x2c5   : > { %v2198_v6 = vrot.slane %v2064_v28, 4  ;;  %v2506_v21 = vpack.c.bf16 %v2167_v30, %v2167_v30  ;;  %v2178_v62 = vrot.slane %v2177_v5, 1  ;;  %v2193_v24 = vadd.f32 %v2192_v17, %v2063_v56 }
 0x2c6   : > { %v2204_v26 = vrot.slane %v2065_v63, 4  ;;  %v2507_v31 = vpack.c.bf16 %v2173_v51, %v2173_v51  ;;  %v2184_v22 = vrot.slane %v2183_v19, 1  ;;  %v2188_v15 = vrot.slane %v2187_v2, 2  ;;  %v5074_v29 = vpop.f32.mrb[4].mxu1 }
 0x2c7   : > { %v2199_v60 = vadd.f32 %v2198_v6, %v2064_v28  ;;  %v2673_v53 = vunpack.c.l.b16 %v2506_v21  ;;  %v2179_v45 = vadd.f32 %v2178_v62, %v2177_v5  ;;  %v2194_v33 = vrot.slane %v2193_v24, 2  ;;  %v5078_v34 = vpop.f32.mrb[5].mxu1 }
 0x2c8   : > { %v2205_v55 = vadd.f32 %v2204_v26, %v2065_v63  ;;  %v5072_v48 = vunpack.c.l.b16 %v2507_v31  ;;  %v2185_v20 = vadd.f32 %v2184_v22, %v2183_v19  ;;  %v2189_v7 = vadd.f32 %v2188_v15, %v2187_v2  ;;  %v5082_v30 = vpop.f32.mrb[6].mxu1 }
 0x2c9   : > { %v2200_v42 = vrot.slane %v2199_v60, 2  ;;  %v2736_v47 = vsel %vm2735_vm3, %v2673_v53, %v5041_v32  ;;  %v2508_v52 = vpack.c.bf16 %v2179_v45, %v2179_v45  ;;  %v2195_v56 = vadd.f32 %v2194_v33, %v2193_v24  ;;  %v5088_v63 = vpop.f32.mrb[7].mxu1 }
 0x2ca   : > { %v2206_v10 = vrot.slane %v2205_v55, 2  ;;  %v2509_v27 = vpack.c.bf16 %v2185_v20, %v2185_v20  ;;  %v2190_v35 = vrot.slane %v2189_v7, 1  ;;  %v1728_v28 = vadd.f32 %v5030_v61, %v4855_v57 }
 0x2cb   : > { %v2201_v40 = vadd.f32 %v2200_v42, %v2199_v60  ;;  %v2675_v5 = vunpack.c.l.b16 %v2508_v52  ;;  %v2196_v17 = vrot.slane %v2195_v56, 1  ;;  %v1730_v32 = vadd.f32 %v5033_v8, %v4857_v58 }
 0x2cc   : > { %v5084_v18 = vadd.f32 %v2206_v10, %v2205_v55  ;;  %v5090_v51 = vunpack.c.l.b16 %v2509_v27  ;;  %v2191_v19 = vadd.f32 %v2190_v35, %v2189_v7  ;;  %v1874_v6 = vadd.f32 %v4866_v13, %v1728_v28 }
 0x2cd   : > { %v2202_v2 = vrot.slane %v2201_v40, 1  ;;  %v5094_v21 = vsel %vm2737_vm4, %v2675_v5, %v2736_v47  ;;  %v5096_v57 = vadd.f32 %v2196_v17, %v2195_v56  ;;  %v1875_v62 = vadd.f32 %v4868_v50, %v1730_v32 }
 0x2ce   : > { %v2510_v24 = vpack.c.bf16 %v2191_v19, %v2191_v19  ;;  %v1938_v58 = vmax.f32 %v1874_v6, 0.0  ;;  %v1732_v8 = vadd.f32 %v5038_v36, %v4859_v37  ;;  %v1734_v15 = vadd.f32 %v5046_v9, %v4861_v38  ;;  %v5113_v7 = vpop.f32.mrb[8].mxu1 }
 0x2cf   : > { %v2203_v26 = vadd.f32 %v2202_v2, %v2201_v40  ;;  %v1939_v22 = vmax.f32 %v1875_v62, 0.0  ;;  %v1878_v60 = vadd.f32 %v4866_v13, %v5058_v46  ;;  %v5632_v33 = vunpack.c.l.bf16 %v4911_v43  ;;  %v5120_v9 = vpop.f32.mrb[9].mxu1 }
 0x2d0   : > { %v5108_v53 = vunpack.c.l.b16 %v2510_v24  ;;  %v1876_v20 = vadd.f32 %v4866_v13, %v1732_v8  ;;  %v5633_v37 = vunpack.c.h.bf16 %v4911_v43  ;;  %v1877_v42 = vadd.f32 %v4868_v50, %v1734_v15  ;;  %v5126_v27 = vpop.f32.mrb[10].mxu1 }
 0x2d1   : > { %v2512_v45 = vpack.c.bf16 %v2203_v26, %v2203_v26  ;;  %v2066_v55 = vadd.f32 %v5632_v33, %v1938_v58  ;;  %v1942_v47 = vmax.f32 %v1878_v60, 0.0  ;;  %v1879_v38 = vadd.f32 %v4868_v50, %v5062_v59  ;;  %v5130_v17 = vpop.f32.mrb[11].mxu1 }
 0x2d2   : > { %v2067_v36 = vadd.f32 %v5633_v37, %v1939_v22  ;;  %v1940_v56 = vmax.f32 %v1876_v20, 0.0  ;;  %v1880_v10 = vadd.f32 %v4866_v13, %v5066_v16  ;;  %v1941_v43 = vmax.f32 %v1877_v42, 0.0 }
 0x2d3   : > { %v5122_v46 = vunpack.c.l.b16 %v2512_v45  ;;  %v2210_v52 = vrot.slane %v2066_v55, 4  ;;  %v5635_v40 = vunpack.c.l.bf16 %v4921_v49  ;;  %v1943_v5 = vmax.f32 %v1879_v38, 0.0 }
 0x2d4   : > { %v2216_v35 = vrot.slane %v2067_v36, 4  ;;  %v5636_v32 = vunpack.c.l.bf16 %v4916_v0  ;;  %v1944_v2 = vmax.f32 %v1880_v10, 0.0  ;;  %v1881_v6 = vadd.f32 %v4868_v50, %v5070_v39 }
 0x2d5   : > { %5634 = vst [vmem:[#allocation22_spill] sm:$0xff] %v5122_v46  ;;  %v2070_v28 = vadd.f32 %v5635_v40, %v1942_v47  ;;  %v2211_v59 = vadd.f32 %v2210_v52, %v2066_v55  ;;  %v5637_v16 = vunpack.c.h.bf16 %v4916_v0  ;;  %v5638_v58 = vunpack.c.h.bf16 %v4921_v49 }
 0x2d6   : > { %v2068_v19 = vadd.f32 %v5636_v32, %v1940_v56  ;;  %v2217_v62 = vadd.f32 %v2216_v35, %v2067_v36  ;;  %v5639_v60 = vunpack.c.l.bf16 %v4926_v3  ;;  %v1945_v33 = vmax.f32 %v1881_v6, 0.0  ;;  %v5144_v52 = vpop.f32.mrb[12].mxu1 }
 0x2d7   : > { %v2069_v24 = vadd.f32 %v5637_v16, %v1941_v43  ;;  %v2234_v26 = vrot.slane %v2070_v28, 4  ;;  %v2071_v8 = vadd.f32 %v5638_v58, %v1943_v5  ;;  %v2212_v22 = vrot.slane %v2211_v59, 2  ;;  %v5146_v43 = vpop.f32.mrb[13].mxu1 }
 0x2d8   : > { %v2222_v15 = vrot.slane %v2068_v19, 4  ;;  %v2072_v45 = vadd.f32 %v5639_v60, %v1944_v2  ;;  %v2218_v55 = vrot.slane %v2217_v62, 2  ;;  %v5640_v0 = vunpack.c.h.bf16 %v4926_v3 }
 0x2d9   : > { %v2228_v20 = vrot.slane %v2069_v24, 4  ;;  %v2235_v37 = vadd.f32 %v2234_v26, %v2070_v28  ;;  %v2240_v42 = vrot.slane %v2071_v8, 4  ;;  %v2213_v47 = vadd.f32 %v2212_v22, %v2211_v59  ;;  %v5148_v28 = vpop.f32.mrb[14].mxu1 }
 0x2da   : > { %v2223_v39 = vadd.f32 %v2222_v15, %v2068_v19  ;;  %v2246_v36 = vrot.slane %v2072_v45, 4  ;;  %v2073_v38 = vadd.f32 %v5640_v0, %v1945_v33  ;;  %v2219_v49 = vadd.f32 %v2218_v55, %v2217_v62  ;;  %v5150_v3 = vpop.f32.mrb[15].mxu1 }
 0x2db   : > { %v2229_v56 = vadd.f32 %v2228_v20, %v2069_v24  ;;  %v2236_v10 = vrot.slane %v2235_v37, 2  ;;  %v2241_v35 = vadd.f32 %v2240_v42, %v2071_v8  ;;  %v2214_v40 = vrot.slane %v2213_v47, 1 }
 0x2dc   : > { %v2224_v5 = vrot.slane %v2223_v39, 2  ;;  %v2247_v32 = vadd.f32 %v2246_v36, %v2072_v45  ;;  %v2252_v2 = vrot.slane %v2073_v38, 4  ;;  %v2220_v59 = vrot.slane %v2219_v49, 1 }
 0x2dd   : > { %v2230_v19 = vrot.slane %v2229_v56, 2  ;;  %v2237_v6 = vadd.f32 %v2236_v10, %v2235_v37  ;;  %v2242_v16 = vrot.slane %v2241_v35, 2  ;;  %v2215_v26 = vadd.f32 %v2214_v40, %v2213_v47 }
 0x2de   : > { %v2225_v58 = vadd.f32 %v2224_v5, %v2223_v39  ;;  %v2248_v62 = vrot.slane %v2247_v32, 2  ;;  %v2253_v24 = vadd.f32 %v2252_v2, %v2073_v38  ;;  %v2221_v22 = vadd.f32 %v2220_v59, %v2219_v49  ;;  %v5152_v47 = vpop.f32.mrb[16].mxu1 }
 0x2df   : > { %v2231_v8 = vadd.f32 %v2230_v19, %v2229_v56  ;;  %v2238_v15 = vrot.slane %v2237_v6, 1  ;;  %v2243_v60 = vadd.f32 %v2242_v16, %v2241_v35  ;;  %v2514_v33 = vpack.c.bf16 %v2215_v26, %v2215_v26  ;;  %v5154_v40 = vpop.f32.mrb[17].mxu1 }
 0x2e0   : > { %v2226_v55 = vrot.slane %v2225_v58, 1  ;;  %v2249_v45 = vadd.f32 %v2248_v62, %v2247_v32  ;;  %v2254_v20 = vrot.slane %v2253_v24, 2  ;;  %v2515_v42 = vpack.c.bf16 %v2221_v22, %v2221_v22  ;;  %v5158_v59 = vpop.f32.mrb[18].mxu1 }
 0x2e1   : > { %v2232_v36 = vrot.slane %v2231_v8, 1  ;;  %v2239_v0 = vadd.f32 %v2238_v15, %v2237_v6  ;;  %v2244_v31 = vrot.slane %v2243_v60, 1  ;;  %v2681_v37 = vunpack.c.l.b16 %v2514_v33 }
 0x2e2   : > { %v2227_v10 = vadd.f32 %v2226_v55, %v2225_v58  ;;  %v2250_v61 = vrot.slane %v2249_v45, 1  ;;  %v2255_v46 = vadd.f32 %v2254_v20, %v2253_v24  ;;  %v2682_v39 = vunpack.c.l.b16 %v2515_v42  ;;  %v5162_v58 = vpop.f32.mrb[19].mxu1 }
 0x2e3   : > { %v2233_v38 = vadd.f32 %v2232_v36, %v2231_v8  ;;  %v2518_v49 = vpack.c.bf16 %v2239_v0, %v2239_v0  ;;  %v2245_v56 = vadd.f32 %v2244_v31, %v2243_v60  ;;  %v1882_v2 = vadd.f32 %v4866_v13, %v5074_v29 }
 0x2e4   : > { %v2516_v35 = vpack.c.bf16 %v2227_v10, %v2227_v10  ;;  %v2251_v5 = vadd.f32 %v2250_v61, %v2249_v45  ;;  %v2256_v32 = vrot.slane %v2255_v46, 1  ;;  %v1883_v26 = vadd.f32 %v4868_v50, %v5078_v34 }
 0x2e5   : > { %v2517_v19 = vpack.c.bf16 %v2233_v38, %v2233_v38  ;;  %v2685_v6 = vunpack.c.l.b16 %v2518_v49  ;;  %v2519_v16 = vpack.c.bf16 %v2245_v56, %v2245_v56  ;;  %v1946_v22 = vmax.f32 %v1882_v2, 0.0 }
 0x2e6   : > { %v2683_v62 = vunpack.c.l.b16 %v2516_v35  ;;  %v2520_v31 = vpack.c.bf16 %v2251_v5, %v2251_v5  ;;  %v2257_v24 = vadd.f32 %v2256_v32, %v2255_v46  ;;  %v1947_v15 = vmax.f32 %v1883_v26, 0.0  ;;  %v5181_v49 = vpop.f32.mrb[20].mxu1 }
 0x2e7   : > { %v2684_v8 = vunpack.c.l.b16 %v2517_v19  ;;  %v2686_v61 = vunpack.c.l.b16 %v2519_v16  ;;  %v1884_v29 = vadd.f32 %v4866_v13, %v5082_v30  ;;  %v5641_v45 = vunpack.c.l.bf16 %v4932_v11  ;;  %v5189_v32 = vpop.f32.mrb[21].mxu1 }
 0x2e8   : > { %v2750_v60 = vsel %vm2729_vm0, %v2683_v62, %v2681_v37  ;;  %v2687_v33 = vunpack.c.l.b16 %v2520_v31  ;;  %v2521_v55 = vpack.c.bf16 %v2257_v24, %v2257_v24  ;;  %v5642_v46 = vunpack.c.h.bf16 %v4932_v11  ;;  %v5197_v26 = vpop.f32.mrb[22].mxu1 }
 0x2e9   : > { %v2074_v20 = vadd.f32 %v5641_v45, %v1946_v22  ;;  %v2757_v34 = vsel %vm2729_vm0, %v2684_v8, %v2682_v39  ;;  %v2751_v42 = vsel %vm2731_vm1, %v2685_v6, %v2750_v60  ;;  %v1948_v0 = vmax.f32 %v1884_v29, 0.0  ;;  %v5199_v22 = vpop.f32.mrb[23].mxu1 }
 0x2ea   : > { %v2075_v36 = vadd.f32 %v5642_v46, %v1947_v15  ;;  %v5174_v10 = vsel %vm2731_vm1, %v2686_v61, %v2757_v34  ;;  %v5177_v30 = vsel %vm2733_vm2, %v2687_v33, %v2751_v42  ;;  %v5179_v37 = vunpack.c.l.b16 %v2521_v55 }
 0x2eb   : > { %v2258_v38 = vrot.slane %v2074_v20, 4  ;;  %v5643_v39 = vunpack.c.l.bf16 %v4937_v14  ;;  %v1885_v11 = vadd.f32 %v4868_v50, %v5088_v63  ;;  %v1886_v5 = vadd.f32 %v4866_v13, %v5113_v7 }
 0x2ec   : > { %v2264_v56 = vrot.slane %v2075_v36, 4  ;;  %v1887_v19 = vadd.f32 %v4868_v50, %v5120_v9  ;;  %v1888_v6 = vadd.f32 %v4866_v13, %v5126_v27  ;;  %v1889_v16 = vadd.f32 %v4868_v50, %v5130_v17 }
 0x2ed   : > { %v2076_v35 = vadd.f32 %v5643_v39, %v1948_v0  ;;  %v2259_v2 = vadd.f32 %v2258_v38, %v2074_v20  ;;  %v1949_v63 = vmax.f32 %v1885_v11, 0.0  ;;  %v1950_v24 = vmax.f32 %v1886_v5, 0.0 }
 0x2ee   : > { %v2265_v62 = vadd.f32 %v2264_v56, %v2075_v36  ;;  %v1951_v8 = vmax.f32 %v1887_v19, 0.0  ;;  %v1952_v61 = vmax.f32 %v1888_v6, 0.0  ;;  %v1953_v15 = vmax.f32 %v1889_v16, 0.0  ;;  %v5211_v19 = vpop.f32.mrb[24].mxu1 }
 0x2ef   : > { %v2270_v31 = vrot.slane %v2076_v35, 4  ;;  %v2260_v7 = vrot.slane %v2259_v2, 2  ;;  %v5644_v60 = vunpack.c.h.bf16 %v4937_v14  ;;  %v5645_v33 = vunpack.c.l.bf16 %v4943_v25 }
 0x2f0   : > { %v2266_v29 = vrot.slane %v2265_v62, 2  ;;  %v5646_v45 = vunpack.c.h.bf16 %v4943_v25  ;;  %v5647_v34 = vunpack.c.l.bf16 %v4950_v44  ;;  %v5648_v46 = vunpack.c.h.bf16 %v4950_v44 }
 0x2f1   : > { %v2271_v9 = vadd.f32 %v2270_v31, %v2076_v35  ;;  %v2077_v27 = vadd.f32 %v5644_v60, %v1949_v63  ;;  %v2078_v17 = vadd.f32 %v5645_v33, %v1950_v24  ;;  %v2261_v55 = vadd.f32 %v2260_v7, %v2259_v2  ;;  %v5213_v31 = vpop.f32.mrb[25].mxu1 }
 0x2f2   : > { %v2079_v20 = vadd.f32 %v5646_v45, %v1951_v8  ;;  %v2080_v42 = vadd.f32 %v5647_v34, %v1952_v61  ;;  %v2081_v36 = vadd.f32 %v5648_v46, %v1953_v15  ;;  %v2267_v0 = vadd.f32 %v2266_v29, %v2265_v62  ;;  %v5215_v62 = vpop.f32.mrb[26].mxu1 }
 0x2f3   : > { %v2272_v38 = vrot.slane %v2271_v9, 2  ;;  %v2276_v56 = vrot.slane %v2077_v27, 4  ;;  %v2282_v39 = vrot.slane %v2078_v17, 4  ;;  %v2262_v35 = vrot.slane %v2261_v55, 1  ;;  %v5217_v60 = vpop.f32.mrb[27].mxu1 }
 0x2f4   : > { %v2288_v14 = vrot.slane %v2079_v20, 4  ;;  %v2294_v11 = vrot.slane %v2080_v42, 4  ;;  %v2300_v5 = vrot.slane %v2081_v36, 4  ;;  %v2268_v2 = vrot.slane %v2267_v0, 1 }
 0x2f5   : > { %v2273_v6 = vadd.f32 %v2272_v38, %v2271_v9  ;;  %v2277_v25 = vadd.f32 %v2276_v56, %v2077_v27  ;;  %v2283_v16 = vadd.f32 %v2282_v39, %v2078_v17  ;;  %v2263_v63 = vadd.f32 %v2262_v35, %v2261_v55 }
 0x2f6   : > { %v2289_v24 = vadd.f32 %v2288_v14, %v2079_v20  ;;  %v2295_v44 = vadd.f32 %v2294_v11, %v2080_v42  ;;  %v2301_v7 = vadd.f32 %v2300_v5, %v2081_v36  ;;  %v2269_v8 = vadd.f32 %v2268_v2, %v2267_v0 }
 0x2f7   : > { %v2274_v61 = vrot.slane %v2273_v6, 1  ;;  %v2278_v15 = vrot.slane %v2277_v25, 2  ;;  %v2284_v29 = vrot.slane %v2283_v16, 2  ;;  %v2522_v33 = vpack.c.bf16 %v2263_v63, %v2263_v63  ;;  %v5223_v63 = vpop.f32.mrb[28].mxu1 }
 0x2f8   : > { %v2290_v45 = vrot.slane %v2289_v24, 2  ;;  %v2296_v34 = vrot.slane %v2295_v44, 2  ;;  %v2302_v9 = vrot.slane %v2301_v7, 2  ;;  %v2523_v27 = vpack.c.bf16 %v2269_v8, %v2269_v8 }
 0x2f9   : > { %v2275_v17 = vadd.f32 %v2274_v61, %v2273_v6  ;;  %v2279_v46 = vadd.f32 %v2278_v15, %v2277_v25  ;;  %v2285_v38 = vadd.f32 %v2284_v29, %v2283_v16  ;;  %v2689_v55 = vunpack.c.l.b16 %v2522_v33 }
 0x2fa   : > { %v2291_v20 = vadd.f32 %v2290_v45, %v2289_v24  ;;  %v2297_v42 = vadd.f32 %v2296_v34, %v2295_v44  ;;  %v2303_v36 = vadd.f32 %v2302_v9, %v2301_v7  ;;  %v5219_v56 = vunpack.c.l.b16 %v2523_v27  ;;  %v5227_v44 = vpop.f32.mrb[29].mxu1 }
 0x2fb   : > { %v2524_v0 = vpack.c.bf16 %v2275_v17, %v2275_v17  ;;  %v2280_v39 = vrot.slane %v2279_v46, 1  ;;  %v2286_v35 = vrot.slane %v2285_v38, 1  ;;  %v2753_v14 = vsel %vm2735_vm3, %v2689_v55, %v5177_v30  ;;  %v5233_v15 = vpop.f32.mrb[30].mxu1 }
 0x2fc   : > { %v2292_v11 = vrot.slane %v2291_v20, 1  ;;  %v2298_v5 = vrot.slane %v2297_v42, 1  ;;  %v2304_v2 = vrot.slane %v2303_v36, 1  ;;  %v1890_v24 = vadd.f32 %v4866_v13, %v5144_v52  ;;  %v5236_v9 = vpop.f32.mrb[31].mxu1 }
 0x2fd   : > { %v2691_v6 = vunpack.c.l.b16 %v2524_v0  ;;  %v2281_v25 = vadd.f32 %v2280_v39, %v2279_v46  ;;  %v2287_v16 = vadd.f32 %v2286_v35, %v2285_v38  ;;  %v1891_v30 = vadd.f32 %v4868_v50, %v5146_v43 }
 0x2fe   : > { %v2293_v7 = vadd.f32 %v2292_v11, %v2291_v20  ;;  %v2299_v8 = vadd.f32 %v2298_v5, %v2297_v42  ;;  %v5229_v61 = vadd.f32 %v2304_v2, %v2303_v36  ;;  %v1954_v34 = vmax.f32 %v1890_v24, 0.0  ;;  %v5263_v24 = vpop.f32.mrb[32].mxu1 }
 0x2ff   : > { %v2754_v29 = vsel %vm2737_vm4, %v2691_v6, %v2753_v14  ;;  %v2525_v33 = vpack.c.bf16 %v2281_v25, %v2281_v25  ;;  %v2526_v45 = vpack.c.bf16 %v2287_v16, %v2287_v16  ;;  %v1955_v46 = vmax.f32 %v1891_v30, 0.0  ;;  %5651 = vst [vmem:[#allocation23_spill] sm:$0xff] %v5263_v24 }
 0x300   : > { %v2527_v27 = vpack.c.bf16 %v2293_v7, %v2293_v7  ;;  %v2528_v52 = vpack.c.bf16 %v2299_v8, %v2299_v8  ;;  %v5649_v43 = vunpack.c.l.bf16 %v4957_v41  ;;  %v1892_v42 = vadd.f32 %v4866_v13, %v5148_v28 }
 0x301   : > { %v5240_v38 = vunpack.c.l.b16 %v2525_v33  ;;  %v2693_v55 = vunpack.c.l.b16 %v2526_v45  ;;  %v5650_v39 = vunpack.c.h.bf16 %v4957_v41  ;;  %v1893_v14 = vadd.f32 %v4868_v50, %v5150_v3  ;;  %v5269_v33 = vpop.f32.mrb[33].mxu1 }
 0x302   : > { %v2082_v20 = vadd.f32 %v5649_v43, %v1954_v34  ;;  %v5246_v36 = vunpack.c.l.b16 %v2527_v27  ;;  %v5248_v0 = vunpack.c.l.b16 %v2528_v52  ;;  %v1956_v2 = vmax.f32 %v1892_v42, 0.0  ;;  %5653 = vst [vmem:[#allocation24_spill] sm:$0xff] %v5269_v33  ;;  %v5273_v52 = vpop.f32.mrb[34].mxu1 }
 0x303   : > { %v2083_v35 = vadd.f32 %v5650_v39, %v1955_v46  ;;  %v5255_v11 = vsel %vm2739_vm5, %v2693_v55, %v2754_v29  ;;  %v1894_v6 = vadd.f32 %v4866_v13, %v5152_v47  ;;  %v1957_v28 = vmax.f32 %v1893_v14, 0.0  ;;  %5655 = vst [vmem:[#allocation25_spill] sm:$0xff] %v5273_v52  ;;  %v5277_v42 = vpop.f32.mrb[35].mxu1 }
 0x304   : > { %v2306_v5 = vrot.slane %v2082_v20, 4  ;;  %v1895_v16 = vadd.f32 %v4868_v50, %v5154_v40  ;;  %v1896_v41 = vadd.f32 %v4866_v13, %v5158_v59  ;;  %v5652_v3 = vunpack.c.l.bf16 %v4963_v1  ;;  %5657 = vst [vmem:[#allocation26_spill] sm:$0xff] %v5277_v42 }
 0x305   : > { %v2312_v25 = vrot.slane %v2083_v35, 4  ;;  %v1958_v30 = vmax.f32 %v1894_v6, 0.0  ;;  %v1897_v29 = vadd.f32 %v4868_v50, %v5162_v58  ;;  %v5654_v45 = vunpack.c.h.bf16 %v4963_v1 }
 0x306   : > { %v2307_v7 = vadd.f32 %v2306_v5, %v2082_v20  ;;  %v2084_v8 = vadd.f32 %v5652_v3, %v1956_v2  ;;  %v1959_v40 = vmax.f32 %v1895_v16, 0.0  ;;  %v1960_v27 = vmax.f32 %v1896_v41, 0.0  ;;  %v5659_v5 = vld [vmem:[#allocation19_spill] sm:$0xff]  ;;  %v5285_v24 = vpop.f32.mrb[36].mxu1 }
 0x307   : > { %v2313_v47 = vadd.f32 %v2312_v25, %v2083_v35  ;;  %v2085_v34 = vadd.f32 %v5654_v45, %v1957_v28  ;;  %v5656_v55 = vunpack.c.l.bf16 %v4969_v54  ;;  %v1961_v20 = vmax.f32 %v1897_v29, 0.0 }
 0x308   : > { %v2308_v59 = vrot.slane %v2307_v7, 2  ;;  %v2318_v46 = vrot.slane %v2084_v8, 4  ;;  %v5658_v14 = vunpack.c.h.bf16 %v4969_v54  ;;  %v5660_v1 = vunpack.c.l.bf16 %v5659_v5 }
 0x309   : > { %v2086_v43 = vadd.f32 %v5656_v55, %v1958_v30  ;;  %v2314_v39 = vrot.slane %v2313_v47, 2  ;;  %v2324_v58 = vrot.slane %v2085_v34, 4  ;;  %v5661_v16 = vunpack.c.h.bf16 %v5659_v5 }
 0x30a   : > { %v2087_v35 = vadd.f32 %v5658_v14, %v1959_v40  ;;  %v2088_v2 = vadd.f32 %v5660_v1, %v1960_v27  ;;  %v2309_v6 = vadd.f32 %v2308_v59, %v2307_v7  ;;  %v2319_v25 = vadd.f32 %v2318_v46, %v2084_v8  ;;  %v5287_v46 = vpop.f32.mrb[37].mxu1 }
 0x30b   : > { %v2330_v28 = vrot.slane %v2086_v43, 4  ;;  %v2089_v41 = vadd.f32 %v5661_v16, %v1961_v20  ;;  %v2315_v3 = vadd.f32 %v2314_v39, %v2313_v47  ;;  %v2325_v45 = vadd.f32 %v2324_v58, %v2085_v34  ;;  %v5289_v58 = vpop.f32.mrb[38].mxu1 }
 0x30c   : > { %v2336_v30 = vrot.slane %v2087_v35, 4  ;;  %v2342_v29 = vrot.slane %v2088_v2, 4  ;;  %v2310_v55 = vrot.slane %v2309_v6, 1  ;;  %v2320_v17 = vrot.slane %v2319_v25, 2 }
 0x30d   : > { %v2331_v42 = vadd.f32 %v2330_v28, %v2086_v43  ;;  %v2348_v52 = vrot.slane %v2089_v41, 4  ;;  %v2316_v33 = vrot.slane %v2315_v3, 1  ;;  %v2326_v54 = vrot.slane %v2325_v45, 2 }
 0x30e   : > { %v2337_v40 = vadd.f32 %v2336_v30, %v2087_v35  ;;  %v2343_v14 = vadd.f32 %v2342_v29, %v2088_v2  ;;  %v2311_v7 = vadd.f32 %v2310_v55, %v2309_v6  ;;  %v2321_v8 = vadd.f32 %v2320_v17, %v2319_v25  ;;  %v5291_v35 = vpop.f32.mrb[39].mxu1 }
 0x30f   : > { %v2332_v27 = vrot.slane %v2331_v42, 2  ;;  %v2349_v59 = vadd.f32 %v2348_v52, %v2089_v41  ;;  %v2317_v47 = vadd.f32 %v2316_v33, %v2315_v3  ;;  %v2327_v34 = vadd.f32 %v2326_v54, %v2325_v45  ;;  %5662 = vst [vmem:[#allocation19_spill] sm:$0xff] %v5291_v35 }
 0x310   : > { %v2338_v20 = vrot.slane %v2337_v40, 2  ;;  %v2344_v39 = vrot.slane %v2343_v14, 2  ;;  %v2530_v43 = vpack.c.bf16 %v2311_v7, %v2311_v7  ;;  %v2322_v5 = vrot.slane %v2321_v8, 1 }
 0x311   : > { %v2333_v1 = vadd.f32 %v2332_v27, %v2331_v42  ;;  %v2350_v28 = vrot.slane %v2349_v59, 2  ;;  %v2531_v2 = vpack.c.bf16 %v2317_v47, %v2317_v47  ;;  %v2328_v16 = vrot.slane %v2327_v34, 1 }
 0x312   : > { %v2339_v6 = vadd.f32 %v2338_v20, %v2337_v40  ;;  %v2345_v17 = vadd.f32 %v2344_v39, %v2343_v14  ;;  %v2697_v25 = vunpack.c.l.b16 %v2530_v43  ;;  %v2323_v52 = vadd.f32 %v2322_v5, %v2321_v8  ;;  %v5297_v14 = vpop.f32.mrb[40].mxu1 }
 0x313   : > { %v2334_v41 = vrot.slane %v2333_v1, 1  ;;  %v2351_v30 = vadd.f32 %v2350_v28, %v2349_v59  ;;  %v2698_v33 = vunpack.c.l.b16 %v2531_v2  ;;  %v2329_v3 = vadd.f32 %v2328_v16, %v2327_v34  ;;  %v5299_v39 = vpop.f32.mrb[41].mxu1 }
 0x314   : > { %v2340_v45 = vrot.slane %v2339_v6, 1  ;;  %v2346_v29 = vrot.slane %v2345_v17, 1  ;;  %v2532_v55 = vpack.c.bf16 %v2323_v52, %v2323_v52  ;;  %v1898_v42 = vadd.f32 %v4866_v13, %v5181_v49  ;;  %v5301_v49 = vpop.f32.mrb[42].mxu1 }
 0x315   : > { %v2335_v54 = vadd.f32 %v2334_v41, %v2333_v1  ;;  %v2352_v7 = vrot.slane %v2351_v30, 1  ;;  %v2533_v27 = vpack.c.bf16 %v2329_v3, %v2329_v3  ;;  %v1899_v40 = vadd.f32 %v4868_v50, %v5189_v32  ;;  %v5663_v32 = vld [vmem:[#allocation20_spill] sm:$0xff]  ;;  %v5306_v41 = vpop.f32.mrb[43].mxu1 }
 0x316   : > { %v2341_v35 = vadd.f32 %v2340_v45, %v2339_v6  ;;  %v2347_v47 = vadd.f32 %v2346_v29, %v2345_v17  ;;  %v2699_v8 = vunpack.c.l.b16 %v2532_v55  ;;  %v1962_v34 = vmax.f32 %v1898_v42, 0.0 }
 0x317   : > { %v2534_v59 = vpack.c.bf16 %v2335_v54, %v2335_v54  ;;  %v2353_v20 = vadd.f32 %v2352_v7, %v2351_v30  ;;  %v2700_v43 = vunpack.c.l.b16 %v2533_v27  ;;  %v1963_v28 = vmax.f32 %v1899_v40, 0.0 }
 0x318   : > { %v2535_v5 = vpack.c.bf16 %v2341_v35, %v2341_v35  ;;  %v2536_v1 = vpack.c.bf16 %v2347_v47, %v2347_v47  ;;  %v2764_v2 = vsel %vm2729_vm0, %v2699_v8, %v2697_v25  ;;  %v5664_v17 = vunpack.c.l.bf16 %v5663_v32 }
 0x319   : > { %v2701_v16 = vunpack.c.l.b16 %v2534_v59  ;;  %v2537_v6 = vpack.c.bf16 %v2353_v20, %v2353_v20  ;;  %v2771_v30 = vsel %vm2729_vm0, %v2700_v43, %v2698_v33  ;;  %v5665_v35 = vunpack.c.h.bf16 %v5663_v32 }
 0x31a   : > { %v2090_v52 = vadd.f32 %v5664_v17, %v1962_v34  ;;  %v2702_v3 = vunpack.c.l.b16 %v2535_v5  ;;  %v5309_v45 = vunpack.c.l.b16 %v2536_v1  ;;  %v1900_v7 = vadd.f32 %v4866_v13, %v5197_v26 }
 0x31b   : > { %v2091_v29 = vadd.f32 %v5665_v35, %v1963_v28  ;;  %v5314_v55 = vsel %vm2731_vm1, %v2701_v16, %v2764_v2  ;;  %v5316_v54 = vunpack.c.l.b16 %v2537_v6  ;;  %v1901_v33 = vadd.f32 %v4868_v50, %v5199_v22  ;;  %v5669_v16 = vld [vmem:[#allocation21_spill] sm:$0xff] }
 0x31c   : > { %v2354_v25 = vrot.slane %v2090_v52, 4  ;;  %v5321_v42 = vsel %vm2731_vm1, %v2702_v3, %v2771_v30  ;;  %v5666_v47 = vrot.slane %v5084_v18, 1  ;;  %v1964_v59 = vmax.f32 %v1900_v7, 0.0 }
 0x31d   : > { %v2360_v27 = vrot.slane %v2091_v29, 4  ;;  %v5667_v20 = vpack.c.bf16 %v5096_v57, %v5096_v57  ;;  %v5668_v26 = vpack.c.bf16 %v5229_v61, %v5229_v61  ;;  %v1965_v1 = vmax.f32 %v1901_v33, 0.0 }
 0x31e   : > { %v2209_v40 = vadd.f32 %v5666_v47, %v5084_v18  ;;  %v2355_v8 = vadd.f32 %v2354_v25, %v2090_v52  ;;  %v2744_v22 = vsel %vm2731_vm1, %v5025_v12, %v5017_v23  ;;  %v5670_v18 = vunpack.c.l.bf16 %v5669_v16 }
 0x31f   : > { %v2678_v34 = vunpack.c.l.b16 %v5667_v20  ;;  %v2696_v43 = vunpack.c.l.b16 %v5668_v26  ;;  %v2361_v5 = vadd.f32 %v2360_v27, %v2091_v29  ;;  %v2745_v32 = vsel %vm2733_vm2, %v5035_v4, %v2744_v22 }
 0x320   : > { %v2513_v28 = vpack.c.bf16 %v2209_v40, %v2209_v40  ;;  %v2356_v2 = vrot.slane %v2355_v8, 2  ;;  %v2092_v6 = vadd.f32 %v5670_v18, %v1964_v59  ;;  %v2759_v57 = vsel %vm2733_vm2, %v5179_v37, %v5174_v10 }
 0x321   : > { %v2362_v61 = vrot.slane %v2361_v5, 2  ;;  %v5671_v17 = vunpack.c.h.bf16 %v5669_v16  ;;  %v2746_v3 = vsel %vm2735_vm3, %v5072_v48, %v2745_v32  ;;  %v2760_v4 = vsel %vm2735_vm3, %v5219_v56, %v2759_v57 }
 0x322   : > { %v2680_v30 = vunpack.c.l.b16 %v2513_v28  ;;  %v2357_v23 = vadd.f32 %v2356_v2, %v2355_v8  ;;  %v2366_v12 = vrot.slane %v2092_v6, 4  ;;  %v2747_v35 = vsel %vm2737_vm4, %v5090_v51, %v2746_v3 }
 0x323   : > { %v2093_v52 = vadd.f32 %v5671_v17, %v1965_v1  ;;  %v2363_v29 = vadd.f32 %v2362_v61, %v2361_v5  ;;  %v2748_v10 = vsel %vm2739_vm5, %v2678_v34, %v2747_v35  ;;  %v2761_v37 = vsel %vm2737_vm4, %v5240_v38, %v2760_v4  ;;  %v5672_v38 = vld [vmem:[#allocation22_spill] sm:$0xff] }
 0x324   : > { %v2358_v7 = vrot.slane %v2357_v23, 1  ;;  %v2367_v27 = vadd.f32 %v2366_v12, %v2092_v6  ;;  %v2749_v33 = vsel %vm2741_vm6, %v2680_v30, %v2748_v10  ;;  %v2762_v48 = vsel %vm2739_vm5, %v5246_v36, %v2761_v37 }
 0x325   : > { %v2372_v25 = vrot.slane %v2093_v52, 4  ;;  %v2364_v47 = vrot.slane %v2363_v29, 1  ;;  %v2763_v40 = vsel %vm2741_vm6, %v2696_v43, %v2762_v48  ;;  %v2740_v56 = vsel %vm2739_vm5, %v5108_v53, %v5094_v21  ;;  %v3990_v21 = vld [vmem:[%s4525_s28 + $0xb0] sm:$0xff] }
 0x326   : > { %v2359_v8 = vadd.f32 %v2358_v7, %v2357_v23  ;;  %v2368_v59 = vrot.slane %v2367_v27, 2  ;;  %v2793_v20 = vpack.c.b16 %v2763_v40, %v2749_v33  ;;  %v2742_v34 = vsel %vm2741_vm6, %v5672_v38, %v2740_v56  ;;  %v3991_v23 = vld [vmem:[%s4525_s28 + $0xb8] sm:$0xff] }
 0x327   : > { %v2373_v51 = vadd.f32 %v2372_v25, %v2093_v52  ;;  %v2365_v26 = vadd.f32 %v2364_v47, %v2363_v29  ;;  %v2756_v36 = vsel %vm2741_vm6, %v5248_v0, %v5255_v11  ;;  %v1902_v1 = vadd.f32 %v4866_v13, %v5211_v19  ;;  %v3992_v47 = vld [vmem:[%s4525_s28 + $0xc0] sm:$0xff] }
 0x328   : > { %v2538_v43 = vpack.c.bf16 %v2359_v8, %v2359_v8  ;;  %v2369_v28 = vadd.f32 %v2368_v59, %v2367_v27  ;;  %2928 = vmatprep.mubr.bf16.mxu0 %v2793_v20  ;;  %v2792_v22 = vpack.c.b16 %v2756_v36, %v2742_v34  ;;  %v2030_v53 = vunpack.c.l.bf16 %v3990_v21 }
 0x329   : > { %v2374_v5 = vrot.slane %v2373_v51, 2  ;;  %v2539_v2 = vpack.c.bf16 %v2365_v26, %v2365_v26  ;;  %v1966_v18 = vmax.f32 %v1902_v1, 0.0  ;;  %v1903_v6 = vadd.f32 %v4868_v50, %v5213_v31 }
 0x32a   : > { %v5372_v32 = vunpack.c.l.b16 %v2538_v43  ;;  %v2370_v57 = vrot.slane %v2369_v28, 1  ;;  %2929 = vmatmul.mubr.bf16.vlgmr.msra.gmra.mrb[84].mxu0 %v2792_v22  ;;  %v2031_v0 = vunpack.c.h.bf16 %v3990_v21  ;;  %v1904_v19 = vadd.f32 %v4866_v13, %v5215_v62 }
 0x32b   : > { %v2375_v16 = vadd.f32 %v2374_v5, %v2373_v51  ;;  %v5376_v11 = vunpack.c.l.b16 %v2539_v2  ;;  %v2094_v17 = vadd.f32 %v2030_v53, %v1966_v18  ;;  %v1967_v52 = vmax.f32 %v1903_v6, 0.0 }
 0x32c   : > { %v2371_v30 = vadd.f32 %v2370_v57, %v2369_v28  ;;  %v1968_v3 = vmax.f32 %v1904_v19, 0.0  ;;  %v2032_v12 = vunpack.c.l.bf16 %v3991_v23  ;;  %v1905_v31 = vadd.f32 %v4868_v50, %v5217_v60 }
 0x32d   : > { %v2376_v61 = vrot.slane %v2375_v16, 1  ;;  %v2378_v4 = vrot.slane %v2094_v17, 4  ;;  %v2095_v29 = vadd.f32 %v2031_v0, %v1967_v52  ;;  %v2033_v25 = vunpack.c.h.bf16 %v3991_v23 }
 0x32e   : > { %v2540_v10 = vpack.c.bf16 %v2371_v30, %v2371_v30  ;;  %v2096_v37 = vadd.f32 %v2032_v12, %v1968_v3  ;;  %v1969_v62 = vmax.f32 %v1905_v31, 0.0  ;;  %v1906_v7 = vadd.f32 %v4866_v13, %v5223_v63 }
 0x32f   : > { %v2377_v35 = vadd.f32 %v2376_v61, %v2375_v16  ;;  %v2379_v33 = vadd.f32 %v2378_v4, %v2094_v17  ;;  %v2384_v48 = vrot.slane %v2095_v29, 4  ;;  %v2034_v51 = vunpack.c.l.bf16 %v3992_v47  ;;  %v3993_v16 = vld [vmem:[%s4525_s28 + $0xc8] sm:$0xff] }
 0x330   : > { %v5384_v40 = vunpack.c.l.b16 %v2540_v10  ;;  %v2390_v56 = vrot.slane %v2096_v37, 4  ;;  %v2097_v8 = vadd.f32 %v2033_v25, %v1969_v62  ;;  %v1970_v60 = vmax.f32 %v1906_v7, 0.0 }
 0x331   : > { %v2541_v27 = vpack.c.bf16 %v2377_v35, %v2377_v35  ;;  %v2380_v20 = vrot.slane %v2379_v33, 2  ;;  %v2385_v38 = vadd.f32 %v2384_v48, %v2095_v29  ;;  %v1907_v34 = vadd.f32 %v4868_v50, %v5227_v44 }
 0x332   : > { %v2391_v26 = vadd.f32 %v2390_v56, %v2096_v37  ;;  %v2396_v63 = vrot.slane %v2097_v8, 4  ;;  %v2098_v5 = vadd.f32 %v2034_v51, %v1970_v60  ;;  %v2035_v36 = vunpack.c.h.bf16 %v3992_v47 }
 0x333   : > { %v5386_v59 = vunpack.c.l.b16 %v2541_v27  ;;  %v2381_v1 = vadd.f32 %v2380_v20, %v2379_v33  ;;  %v2386_v43 = vrot.slane %v2385_v38, 2  ;;  %v1971_v28 = vmax.f32 %v1907_v34, 0.0 }
 0x334   : > { %v1908_v22 = vadd.f32 %v4866_v13, %v5233_v15  ;;  %v2392_v21 = vrot.slane %v2391_v26, 2  ;;  %v2397_v53 = vadd.f32 %v2396_v63, %v2097_v8  ;;  %v2402_v2 = vrot.slane %v2098_v5, 4  ;;  %v5673_v63 = vld [vmem:[#allocation23_spill] sm:$0xff] }
 0x335   : > { %v2036_v18 = vunpack.c.l.bf16 %v3993_v16  ;;  %v2382_v6 = vrot.slane %v2381_v1, 1  ;;  %v2387_v57 = vadd.f32 %v2386_v43, %v2385_v38  ;;  %v2099_v0 = vadd.f32 %v2035_v36, %v1971_v28  ;;  %v3994_v28 = vld [vmem:[%s4525_s28 + $0xd0] sm:$0xff] }
 0x336   : > { %v1972_v19 = vmax.f32 %v1908_v22, 0.0  ;;  %v2393_v44 = vadd.f32 %v2392_v21, %v2391_v26  ;;  %v2398_v61 = vrot.slane %v2397_v53, 2  ;;  %v2403_v17 = vadd.f32 %v2402_v2, %v2098_v5 }
 0x337   : > { %v1909_v52 = vadd.f32 %v4868_v50, %v5236_v9  ;;  %v2383_v30 = vadd.f32 %v2382_v6, %v2381_v1  ;;  %v2388_v3 = vrot.slane %v2387_v57, 1  ;;  %v2408_v23 = vrot.slane %v2099_v0, 4 }
 0x338   : > { %v2100_v12 = vadd.f32 %v2036_v18, %v1972_v19  ;;  %v2394_v15 = vrot.slane %v2393_v44, 1  ;;  %v2399_v31 = vadd.f32 %v2398_v61, %v2397_v53  ;;  %v2404_v35 = vrot.slane %v2403_v17, 2  ;;  %v5675_v19 = vld [vmem:[#allocation25_spill] sm:$0xff] }
 0x339   : > { %v1973_v4 = vmax.f32 %v1909_v52, 0.0  ;;  %v2542_v29 = vpack.c.bf16 %v2383_v30, %v2383_v30  ;;  %v2389_v25 = vadd.f32 %v2388_v3, %v2387_v57  ;;  %v2409_v10 = vadd.f32 %v2408_v23, %v2099_v0 }
 0x33a   : > { %v2414_v37 = vrot.slane %v2100_v12, 4  ;;  %v5395_v62 = vadd.f32 %v2394_v15, %v2393_v44  ;;  %v2400_v7 = vrot.slane %v2399_v31, 1  ;;  %v2405_v27 = vadd.f32 %v2404_v35, %v2403_v17  ;;  %v3995_v15 = vld [vmem:[%s4525_s28 + $0xd8] sm:$0xff] }
 0x33b   : > { %v2037_v33 = vunpack.c.h.bf16 %v3993_v16  ;;  %v5397_v48 = vunpack.c.l.b16 %v2542_v29  ;;  %v2543_v9 = vpack.c.bf16 %v2389_v25, %v2389_v25  ;;  %v2410_v47 = vrot.slane %v2409_v10, 2  ;;  %v5674_v16 = vld [vmem:[#allocation24_spill] sm:$0xff] }
 0x33c   : > { %v2415_v51 = vadd.f32 %v2414_v37, %v2100_v12  ;;  %v2544_v56 = vpack.c.bf16 %v5395_v62, %v5395_v62  ;;  %v5401_v8 = vadd.f32 %v2400_v7, %v2399_v31  ;;  %v2406_v60 = vrot.slane %v2405_v27, 1  ;;  %v5676_v7 = vld [vmem:[#allocation26_spill] sm:$0xff] }
 0x33d   : > { %v2101_v20 = vadd.f32 %v2037_v33, %v1973_v4  ;;  %v5403_v38 = vunpack.c.l.b16 %v2543_v9  ;;  %v2411_v34 = vadd.f32 %v2410_v47, %v2409_v10  ;;  %v1910_v5 = vadd.f32 %v4866_v13, %v5673_v63 }
 0x33e   : > { %v2416_v26 = vrot.slane %v2415_v51, 2  ;;  %v2545_v36 = vpack.c.bf16 %v5401_v8, %v5401_v8  ;;  %v2407_v1 = vadd.f32 %v2406_v60, %v2405_v27  ;;  %v2038_v22 = vunpack.c.l.bf16 %v3994_v28 }
 0x33f   : > { %v2420_v43 = vrot.slane %v2101_v20, 4  ;;  %v2412_v21 = vrot.slane %v2411_v34, 1  ;;  %v1974_v2 = vmax.f32 %v1910_v5, 0.0  ;;  %v1911_v18 = vadd.f32 %v4868_v50, %v5674_v16 }
 0x340   : > { %v2417_v53 = vadd.f32 %v2416_v26, %v2415_v51  ;;  %v2546_v6 = vpack.c.bf16 %v2407_v1, %v2407_v1  ;;  %v2039_v0 = vunpack.c.h.bf16 %v3994_v28  ;;  %v1912_v44 = vadd.f32 %v4866_v13, %v5675_v19  ;;  %v3996_v28 = vld [vmem:[%s4525_s28 + $0xe0] sm:$0xff] }
 0x341   : > { %v2421_v57 = vadd.f32 %v2420_v43, %v2101_v20  ;;  %v2413_v61 = vadd.f32 %v2412_v21, %v2411_v34  ;;  %v2102_v52 = vadd.f32 %v2038_v22, %v1974_v2  ;;  %v1975_v30 = vmax.f32 %v1911_v18, 0.0 }
 0x342   : > { %v2418_v17 = vrot.slane %v2417_v53, 1  ;;  %v2713_v3 = vunpack.c.l.b16 %v2546_v6  ;;  %v1976_v12 = vmax.f32 %v1912_v44, 0.0  ;;  %v2040_v31 = vunpack.c.l.bf16 %v3995_v15 }
 0x343   : > { %v2422_v23 = vrot.slane %v2421_v57, 2  ;;  %v2547_v35 = vpack.c.bf16 %v2413_v61, %v2413_v61  ;;  %v2426_v29 = vrot.slane %v2102_v52, 4  ;;  %v2103_v25 = vadd.f32 %v2039_v0, %v1975_v30 }
 0x344   : > { %v2419_v4 = vadd.f32 %v2418_v17, %v2417_v53  ;;  %v2104_v37 = vadd.f32 %v2040_v31, %v1976_v12  ;;  %v1913_v27 = vadd.f32 %v4868_v50, %v5676_v7  ;;  %v2041_v33 = vunpack.c.h.bf16 %v3995_v15 }
 0x345   : > { %v2423_v10 = vadd.f32 %v2422_v23, %v2421_v57  ;;  %v2714_v9 = vunpack.c.l.b16 %v2547_v35  ;;  %v2427_v51 = vadd.f32 %v2426_v29, %v2102_v52  ;;  %v2432_v60 = vrot.slane %v2103_v25, 4 }
 0x346   : > { %v2548_v47 = vpack.c.bf16 %v2419_v4, %v2419_v4  ;;  %v2438_v34 = vrot.slane %v2104_v37, 4  ;;  %v1977_v26 = vmax.f32 %v1913_v27, 0.0  ;;  %v1914_v63 = vadd.f32 %v4866_v13, %v5285_v24 }
 0x347   : > { %v2424_v20 = vrot.slane %v2423_v10, 1  ;;  %v2428_v1 = vrot.slane %v2427_v51, 2  ;;  %v2433_v43 = vadd.f32 %v2432_v60, %v2103_v25  ;;  %v2042_v22 = vunpack.c.l.bf16 %v3996_v28 }
 0x348   : > { %v2715_v5 = vunpack.c.l.b16 %v2548_v47  ;;  %v2439_v53 = vadd.f32 %v2438_v34, %v2104_v37  ;;  %v2105_v2 = vadd.f32 %v2041_v33, %v1977_v26  ;;  %v1978_v16 = vmax.f32 %v1914_v63, 0.0  ;;  %v3997_v26 = vld [vmem:[%s4525_s28 + $0xe8] sm:$0xff] }
 0x349   : > { %v2425_v21 = vadd.f32 %v2424_v20, %v2423_v10  ;;  %v2429_v6 = vadd.f32 %v2428_v1, %v2427_v51  ;;  %v2434_v57 = vrot.slane %v2433_v43, 2  ;;  %v1915_v0 = vadd.f32 %v4868_v50, %v5287_v46 }
 0x34a   : > { %v2778_v18 = vsel %vm2729_vm0, %v2715_v5, %v2713_v3  ;;  %v2440_v44 = vrot.slane %v2439_v53, 2  ;;  %v2444_v61 = vrot.slane %v2105_v2, 4  ;;  %v2106_v24 = vadd.f32 %v2042_v22, %v1978_v16 }
 0x34b   : > { %v2549_v19 = vpack.c.bf16 %v2425_v21, %v2425_v21  ;;  %v2430_v17 = vrot.slane %v2429_v6, 1  ;;  %v2435_v52 = vadd.f32 %v2434_v57, %v2433_v43  ;;  %v1979_v30 = vmax.f32 %v1915_v0, 0.0 }
 0x34c   : > { %v2043_v23 = vunpack.c.h.bf16 %v3996_v28  ;;  %v2441_v15 = vadd.f32 %v2440_v44, %v2439_v53  ;;  %v2445_v31 = vadd.f32 %v2444_v61, %v2105_v2  ;;  %v2450_v35 = vrot.slane %v2106_v24, 4  ;;  %v5677_v28 = vld [vmem:[#allocation19_spill] sm:$0xff] }
 0x34d   : > { %v2716_v12 = vunpack.c.l.b16 %v2549_v19  ;;  %v2431_v4 = vadd.f32 %v2430_v17, %v2429_v6  ;;  %v2436_v3 = vrot.slane %v2435_v52, 1  ;;  %v1916_v25 = vadd.f32 %v4866_v13, %v5289_v58 }
 0x34e   : > { %v2107_v29 = vadd.f32 %v2043_v23, %v1979_v30  ;;  %v2442_v10 = vrot.slane %v2441_v15, 1  ;;  %v2446_v37 = vrot.slane %v2445_v31, 2  ;;  %v2451_v7 = vadd.f32 %v2450_v35, %v2106_v24 }
 0x34f   : > { %v2785_v46 = vsel %vm2729_vm0, %v2716_v12, %v2714_v9  ;;  %v2550_v27 = vpack.c.bf16 %v2431_v4, %v2431_v4  ;;  %v2437_v33 = vadd.f32 %v2436_v3, %v2435_v52  ;;  %v1980_v51 = vmax.f32 %v1916_v25, 0.0 }
 0x350   : > { %v2456_v47 = vrot.slane %v2107_v29, 4  ;;  %v2443_v60 = vadd.f32 %v2442_v10, %v2441_v15  ;;  %v2447_v20 = vadd.f32 %v2446_v37, %v2445_v31  ;;  %v2452_v34 = vrot.slane %v2451_v7, 2  ;;  %v3998_v15 = vld [vmem:[%s4525_s28 + $0xf0] sm:$0xff] }
 0x351   : > { %v2044_v63 = vunpack.c.l.bf16 %v3997_v26  ;;  %v2717_v5 = vunpack.c.l.b16 %v2550_v27  ;;  %v2551_v1 = vpack.c.bf16 %v2437_v33, %v2437_v33  ;;  %v1917_v58 = vadd.f32 %v4868_v50, %v5677_v28 }
 0x352   : > { %v2457_v43 = vadd.f32 %v2456_v47, %v2107_v29  ;;  %v2552_v22 = vpack.c.bf16 %v2443_v60, %v2443_v60  ;;  %v2448_v9 = vrot.slane %v2447_v20, 1  ;;  %v2453_v21 = vadd.f32 %v2452_v34, %v2451_v7 }
 0x353   : > { %v2108_v53 = vadd.f32 %v2044_v63, %v1980_v51  ;;  %v5430_v2 = vsel %vm2731_vm1, %v2717_v5, %v2778_v18  ;;  %v2718_v16 = vunpack.c.l.b16 %v2551_v1  ;;  %v1981_v57 = vmax.f32 %v1917_v58, 0.0 }
 0x354   : > { %v2458_v6 = vrot.slane %v2457_v43, 2  ;;  %v5432_v0 = vunpack.c.l.b16 %v2552_v22  ;;  %v2449_v19 = vadd.f32 %v2448_v9, %v2447_v20  ;;  %v2454_v44 = vrot.slane %v2453_v21, 1  ;;  %v3999_v20 = vld [vmem:[%s4525_s28 + $0xf8] sm:$0xff]  ;;  %s3320_s28 = sshll.u32 %s4522_s14, 4 }
 0x355   : > { %v2462_v61 = vrot.slane %v2108_v53, 4  ;;  %v5435_v24 = vsel %vm2731_vm1, %v2718_v16, %v2785_v46  ;;  %v2045_v52 = vunpack.c.h.bf16 %v3997_v26  ;;  %v1918_v30 = vadd.f32 %v4866_v13, %v5297_v14  ;;  %s463_s16 = scalar_lea.vmem [#allocation11], %s3320_s28 }
 0x356   : > { %v2459_v17 = vadd.f32 %v2458_v6, %v2457_v43  ;;  %v2553_v23 = vpack.c.bf16 %v2449_v19, %v2449_v19  ;;  %v2455_v12 = vadd.f32 %v2454_v44, %v2453_v21  ;;  %v2046_v31 = vunpack.c.l.bf16 %v3998_v15  ;;  %s3190_s24 = sshll.u32 %s463_s16, 4  ;;  %s5527_s24 = int_to_ptr.vmem [resolvable:$true] %s3190_s24 }
 0x357   : > { %v2463_v18 = vadd.f32 %v2462_v61, %v2108_v53  ;;  %v2109_v4 = vadd.f32 %v2045_v52, %v1981_v57  ;;  %v1982_v3 = vmax.f32 %v1918_v30, 0.0  ;;  %v1919_v29 = vadd.f32 %v4868_v50, %v5299_v39  ;;  %s4142_s13 = scalar_lea.vmem %s5527_s24, 256 }
 0x358   : > { %v2460_v35 = vrot.slane %v2459_v17, 1  ;;  %v2720_v25 = vunpack.c.l.b16 %v2553_v23  ;;  %v2554_v46 = vpack.c.bf16 %v2455_v12, %v2455_v12  ;;  %v2047_v37 = vunpack.c.h.bf16 %v3998_v15  ;;  %p4143_p7 = scmp.ne.s32.totalorder %s5527_s24, %s4142_s13 }
 0x359   : > { %v2464_v10 = vrot.slane %v2463_v18, 2  ;;  %v2468_v27 = vrot.slane %v2109_v4, 4  ;;  %v2110_v33 = vadd.f32 %v2046_v31, %v1982_v3  ;;  %v1983_v14 = vmax.f32 %v1919_v29, 0.0 }
 0x35a   : > { %v2461_v7 = vadd.f32 %v2460_v35, %v2459_v17  ;;  %v2721_v47 = vunpack.c.l.b16 %v2554_v46  ;;  %v1920_v60 = vadd.f32 %v4866_v13, %v5301_v49  ;;  %v2048_v34 = vunpack.c.l.bf16 %v3999_v20  ;;  %p4144_p11 = pnand %p4143_p7, %p4464_p3 }
 0x35b   : > { %v2465_v51 = vadd.f32 %v2464_v10, %v2463_v18  ;;  %v2469_v63 = vadd.f32 %v2468_v27, %v2109_v4  ;;  %v2474_v5 = vrot.slane %v2110_v33, 4  ;;  %v2111_v1 = vadd.f32 %v2047_v37, %v1983_v14 }
 0x35c   : > { %v2555_v26 = vpack.c.bf16 %v2461_v7, %v2461_v7  ;;  %v1984_v43 = vmax.f32 %v1920_v60, 0.0  ;;  %v1921_v28 = vadd.f32 %v4868_v50, %v5306_v41  ;;  %v2049_v58 = vunpack.c.h.bf16 %v3999_v20  ;;  %p4145_p1 = pneg %p4144_p11 }
 0x35d   : > { %v2466_v39 = vrot.slane %v2465_v51, 1  ;;  %v2470_v9 = vrot.slane %v2469_v63, 2  ;;  %v2475_v21 = vadd.f32 %v2474_v5, %v2110_v33  ;;  %v2480_v53 = vrot.slane %v2111_v1, 4 }
 0x35e   : > { %v2722_v22 = vunpack.c.l.b16 %v2555_v26  ;;  %v2112_v6 = vadd.f32 %v2048_v34, %v1984_v43  ;;  %v1985_v57 = vmax.f32 %v1921_v28, 0.0  ;;  %v2712_v13 = vunpack.c.l.b16 %v2545_v36 }
 0x35f   : > { %v2467_v16 = vadd.f32 %v2466_v39, %v2465_v51  ;;  %v2471_v49 = vadd.f32 %v2470_v9, %v2469_v63  ;;  %v2476_v19 = vrot.slane %v2475_v21, 2  ;;  %v2481_v44 = vadd.f32 %v2480_v53, %v2111_v1 }
 0x360   : > { %v2773_v61 = vsel %vm2733_vm2, %v5316_v54, %v5321_v42  ;;  %v2486_v41 = vrot.slane %v2112_v6, 4  ;;  %v2113_v17 = vadd.f32 %v2049_v58, %v1985_v57  ;;  %v2766_v33 = vsel %vm2733_vm2, %v5309_v45, %v5314_v55  ;;  %v3960_v57 = vld [vmem:[%s5582_s7 + $0x10] sm:$0xff]  }
 0x361   : > { %v2556_v50 = vpack.c.bf16 %v2467_v16, %v2467_v16  ;;  %v2774_v52 = vsel %vm2735_vm3, %v5376_v11, %v2773_v61  ;;  %v2472_v30 = vrot.slane %v2471_v49, 1  ;;  %v2477_v23 = vadd.f32 %v2476_v19, %v2475_v21  ;;  %v3958_v16 = vld [vmem:[%s5582_s7] sm:$0xff]   ;;  %v3963_v19 = vld [vmem:[%s5582_s7 + $0x28] sm:$0xff]   ;;  %v3965_v61 = vld [vmem:[%s5582_s7 + $0x38] sm:$0xff]  }
 0x362   : > { %v2482_v12 = vrot.slane %v2481_v44, 2  ;;  %v2775_v8 = vsel %vm2737_vm4, %v5386_v59, %v2774_v52  ;;  %v2487_v18 = vadd.f32 %v2486_v41, %v2112_v6  ;;  %v2492_v15 = vrot.slane %v2113_v17, 4  ;;  %v3959_v6 = vld [vmem:[%s5582_s7 + $0x8] sm:$0xff]   ;;  %3549 = vmatprep.subr.bf16.mxu0 %v3958_v16  ;;  %v3449_v41 = vld [vmem:[%s5581_s6] ss:$0 sm:$0xff] }
 0x363   : > { %v2723_v36 = vunpack.c.l.b16 %v2556_v50  ;;  %v2776_v31 = vsel %vm2739_vm5, %v5403_v38, %v2775_v8  ;;  %v2473_v35 = vadd.f32 %v2472_v30, %v2471_v49  ;;  %v2478_v54 = vrot.slane %v2477_v23, 1  ;;  %3550 = vmatpush3.bf16.msra.mxu0 %v3958_v16  ;;  %v3962_v49 = vld [vmem:[%s5582_s7 + $0x20] sm:$0xff]  }
 0x364   : > { %v2483_v42 = vadd.f32 %v2482_v12, %v2481_v44  ;;  %v2777_v4 = vsel %vm2741_vm6, %v2712_v13, %v2776_v31  ;;  %v2488_v3 = vrot.slane %v2487_v18, 2  ;;  %v2493_v29 = vadd.f32 %v2492_v15, %v2113_v17  ;;  %3551 = vmatprep.subr.bf16.mxu0 %v3959_v6  ;;  %v3961_v13 = vld [vmem:[%s5582_s7 + $0x18] sm:$0xff]   ;;  %v3964_v44 = vld [vmem:[%s5582_s7 + $0x30] sm:$0xff]  }
 0x365   : > { %v2787_v11 = vsel %vm2733_vm2, %v2720_v25, %v5435_v24  ;;  %v2711_v59 = vunpack.c.l.b16 %v2544_v56  ;;  %v2557_v46 = vpack.c.bf16 %v2473_v35, %v2473_v35  ;;  %v2479_v10 = vadd.f32 %v2478_v54, %v2477_v23 }
 0x366   : > { %v2484_v37 = vrot.slane %v2483_v42, 1  ;;  %v2788_v7 = vsel %vm2735_vm3, %v2722_v22, %v2787_v11  ;;  %v2489_v38 = vadd.f32 %v2488_v3, %v2487_v18  ;;  %v2494_v27 = vrot.slane %v2493_v29, 2 }
 0x367   : > { %v2780_v14 = vsel %vm2733_vm2, %v5432_v0, %v5430_v2  ;;  %v2724_v24 = vunpack.c.l.b16 %v2557_v46  ;;  %v2558_v25 = vpack.c.bf16 %v2479_v10, %v2479_v10  ;;  %v2767_v62 = vsel %vm2735_vm3, %v5372_v32, %v2766_v33  ;;  %3552 = vmatpush3.bf16.msra.mxu0 %v3959_v6 }
 0x368   : > { %v2485_v51 = vadd.f32 %v2484_v37, %v2483_v42  ;;  %v2490_v56 = vrot.slane %v2489_v38, 1  ;;  %v2495_v60 = vadd.f32 %v2494_v27, %v2493_v29  ;;  %v2768_v20 = vsel %vm2737_vm4, %v5384_v40, %v2767_v62  ;;  %3553 = vmatprep.subr.bf16.mxu0 %v3960_v57  ;;  %v3466_v27 = vld [vmem:[%s5678_s8] ss:$0 sm:$0xff]  ;;  %s4146_s8 = sshll.u32 %s4231_s21, 4  ;;  %s4147_s8 = int_to_ptr.vmem [resolvable:$false] %s4146_s8 }
 0x369   : > { %v2781_v34 = vsel %vm2735_vm3, %v2721_v47, %v2780_v14  ;;  %v2725_v26 = vunpack.c.l.b16 %v2558_v25  ;;  %v2789_v45 = vsel %vm2737_vm4, %v2724_v24, %v2788_v7  ;;  %v2769_v55 = vsel %vm2739_vm5, %v5397_v48, %v2768_v20  ;;  %v3966_v7 = vld [vmem:[%s5584_s9] sm:$0xff]   ;;  %s4148_s28 = scalar_lea.vmem %s4147_s8, 512  ;;  %p4149_p2 = scmp.lt.s32.totalorder %s5527_s24, %s4147_s8 }
 0x36a   : > { %v2559_v63 = vpack.c.bf16 %v2485_v51, %v2485_v51  ;;  %v2491_v2 = vadd.f32 %v2490_v56, %v2489_v38  ;;  %v2496_v0 = vrot.slane %v2495_v60, 1  ;;  %v2770_v5 = vsel %vm2741_vm6, %v2711_v59, %v2769_v55  ;;  %v3967_v38 = vld [vmem:[%s5584_s9 + $0x8] sm:$0xff]   ;;  %p4150_p12 = scmp.lt.s32.totalorder %s4148_s28, %s4142_s13 }
 0x36b   : > { %v2782_v32 = vsel %vm2737_vm4, %v2723_v36, %v2781_v34  ;;  %3554 = vmatpush3.bf16.msra.mxu0 %v3960_v57 }
 0x36c   : > { %v2726_v1 = vunpack.c.l.b16 %v2559_v63  ;;  %v2783_v39 = vsel %vm2739_vm5, %v2725_v26, %v2782_v32  ;;  %v2560_v43 = vpack.c.bf16 %v2491_v2, %v2491_v2  ;;  %v2497_v40 = vadd.f32 %v2496_v0, %v2495_v60  ;;  %3555 = vmatprep.subr.bf16.mxu0 %v3961_v13  ;;  %v3475_v0 = vld [vmem:[%s5679_s15] ss:$0 sm:$0xff]  ;;  %p4151_p9 = por %p4150_p12, %p4149_p2 }
 0x36e   : > { %v2790_v47 = vsel %vm2739_vm5, %v2726_v1, %v2789_v45  ;;  %v2561_v28 = vpack.c.bf16 %v2497_v40, %v2497_v40  ;;  %v2727_v58 = vunpack.c.l.b16 %v2560_v43  ;;  %p4152_p13 = pnand %p4151_p9, %p4145_p1 }
 0x36f   : > { %3556 = vmatpush3.bf16.msra.mxu0 %v3961_v13 }
 0x370   : > { %v2728_v22 = vunpack.c.l.b16 %v2561_v28  ;;  %v2784_v9 = vsel %vm2741_vm6, %v2727_v58, %v2783_v39  ;;  %3557 = vmatprep.subr.bf16.mxu0 %v3962_v49 }
 0x371   : > { %v2794_v21 = vpack.c.b16 %v2784_v9, %v2770_v5 }
 0x372   : > { %v2791_v48 = vsel %vm2741_vm6, %v2728_v22, %v2790_v47 }
 0x373   : > { %v2795_v53 = vpack.c.b16 %v2791_v48, %v2777_v4  ;;  %3558 = vmatpush3.bf16.msra.mxu0 %v3962_v49 }
 0x374   : > { %3559 = vmatprep.subr.bf16.mxu0 %v3963_v19 }
 0x375   : > { %2936 = vmatprep.mubr.bf16.mxu0 %v2795_v53 }
 0x376   : > { %2937 = vmatmul.mubr.bf16.gmra.mrb[88].mxu0 %v2794_v21 }
 0x377   : > { %3560 = vmatpush3.bf16.msra.mxu0 %v3963_v19 }
 0x378   : > { %3561 = vmatprep.subr.bf16.mxu0 %v3964_v44 }
 0x37b   : > { %3562 = vmatpush3.bf16.msra.mxu0 %v3964_v44 }
 0x37c   : > { %3563 = vmatprep.subr.bf16.mxu0 %v3965_v61 }
 0x37f   : > { %3564 = vmatpush3.bf16.msra.mxu0 %v3965_v61 }
 0x380   : > { %3569 = vmatprep.subr.bf16.mxu0 %v3966_v7 }
 0x3fd   : > { %v3523_v50 = vpop.f32.mrb[84].mxu0 }
 0x3fe   : > { %v3524_v17 = vpop.f32.mrb[85].mxu0 }
 0x3ff   : > { %v3525_v52 = vadd.f32 %v3524_v17, %v3523_v50  ;;  %v3526_v30 = vpop.f32.mrb[86].mxu0 }
 0x400   : > { %v3527_v23 = vpop.f32.mrb[87].mxu0 }
 0x401   : > { %v2931_v12 = vadd.f32 %v3525_v52, %v3449_v41  ;;  %v3528_v8 = vadd.f32 %v3527_v23, %v3526_v30 }
 0x403   : > { %v2934_v36 = vadd.f32 %v3528_v8, %v3449_v41  ;;  %v2945_v18 = vmax.f32 %v2931_v12, 0.0 }
 0x405   : > { %v2946_v15 = vmax.f32 %v2934_v36, 0.0 }
 0x407   : > { %v2949_v31 = vpack.c.bf16 %v2946_v15, %v2945_v18 }
 0x409   : > { %3565 = vmatprep.mubr.bf16.mxu0 %v2949_v31 }
 0x449   : > { %v3529_v35 = vpop.f32.mrb[88].mxu0 }
 0x44a   : > { %v3530_v54 = vpop.f32.mrb[89].mxu0 }
 0x44b   : > { %v3531_v42 = vadd.f32 %v3530_v54, %v3529_v35  ;;  %v3532_v4 = vpop.f32.mrb[90].mxu0 }
 0x44c   : > { %v3533_v3 = vpop.f32.mrb[91].mxu0 }
 0x44d   : > { %v2939_v29 = vadd.f32 %v3531_v42, %v3449_v41  ;;  %v3534_v11 = vadd.f32 %v3533_v3, %v3532_v4 }
 0x44f   : > { %v2942_v59 = vadd.f32 %v3534_v11, %v3449_v41  ;;  %v2947_v46 = vmax.f32 %v2939_v29, 0.0 }
 0x451   : > { %v2948_v10 = vmax.f32 %v2942_v59, 0.0 }
 0x453   : > { %v2950_v37 = vpack.c.bf16 %v2948_v10, %v2947_v46 }
 0x455   : > { %3566 = vmatmul.mubr.bf16.vlgmr.msra.gmra.mrb[92].mxu0 %v2950_v37 }
 0x456   : > { %3570 = vmatpush3.bf16.msra.mxu0 %v3966_v7 }
 0x457   : > { %3571 = vmatprep.subr.bf16.mxu0 %v3967_v38 }
 0x45a   : > { %3572 = vmatpush3.bf16.msra.mxu0 %v3967_v38 }
 0x528   : > { %v3567_v33 = vpop.f32.mrb[92].mxu0 }
 0x529   : > { %v3065_v14 = vadd.f32 %v3567_v33, %v3466_v27  ;;  %v3056_v24 = vpop.f32.mrb[93].mxu0 }
 0x52a   : > { %v3057_v25 = vadd.f32 %v3466_v27, %v3056_v24  ;;  %v3568_v51 = vpop.f32.mrb[94].mxu0 }
 0x52b   : > { %v3068_v62 = vadd.f32 %v3568_v51, %v3466_v27  ;;  %v3059_v56 = vpop.f32.mrb[95].mxu0  ;;  %v3073_v20 = vmax.f32 %v3065_v14, 0.0 }
 0x52c   : > { %v3060_v60 = vadd.f32 %v3466_v27, %v3059_v56  ;;  %v3071_v26 = vmax.f32 %v3057_v25, 0.0 }
 0x52d   : > { %v3074_v34 = vmax.f32 %v3068_v62, 0.0 }
 0x52e   : > { %v3072_v63 = vmax.f32 %v3060_v60, 0.0 }
 0x52f   : > { %v3076_v45 = vpack.c.bf16 %v3074_v34, %v3073_v20 }
 0x530   : > { %v3075_v55 = vpack.c.bf16 %v3072_v63, %v3071_v26 }
 0x532   : > { %3573 = vmatprep.mubr.msk.bf16.mxu0 %vm3100_vm7, %v3075_v55 }
 0x533   : > { %3574 = vmatmul.mubr.msk.bf16.vlgmr.msra.gmra.mrb[96].mxu0 %vm3100_vm7, %v3076_v45 }
 0x606   : > { %v3575_v2 = vpop.f32.mrb[96].mxu0 }
 0x607   : > { %v3141_v5 = vpop.f32.mrb[97].mxu0  ;;  %v3150_v1 = vadd.f32 %v3575_v2, %v3475_v0 }
 0x608   : > { %v3576_v32 = vpop.f32.mrb[98].mxu0  ;;  %v3142_v40 = vadd.f32 %v3475_v0, %v3141_v5 }
 0x609   : > { %v3153_v39 = vadd.f32 %v3576_v32, %v3475_v0  ;;  %v3144_v43 = vpop.f32.mrb[99].mxu0 }
 0x60a   : > { %v3145_v47 = vadd.f32 %v3475_v0, %v3144_v43 }
 0x60b   : > { %v3504_v28 = vpack.c.bf16 %v3153_v39, %v3150_v1 }
 0x60c   : > { %v3499_v58 = vpack.c.bf16 %v3145_v47, %v3142_v40 }
 0x60d   : > { %3506 = vst [vmem:[%s463_s16 + $0x8] sm:$0xff] %v3504_v28  }
 0x60e   : > { %3500 = vst [vmem:[%s463_s16] sm:$0xff] %v3499_v58  }
 0x60f   : > { %4155 = shalt.err (!%p4152_p13)
}
 0x610   : > { %s4156_s23 = scalar_lea.hbm %s5532_s30, 256  ;;  %s4160_s16 = scalar_lea.hbm %s5680_s27, 1024 }
 0x611   : > { %p4157_p4 = scmp.ne.s32.totalorder %s5532_s30, %s4156_s23  ;;  %p4161_p6 = scmp.lt.u32.totalorder %s5532_s30, %s5680_s27 }
 0x612   : > { %p4162_p0 = scmp.lt.u32.totalorder %s4160_s16, %s4156_s23  ;;  %p4164_p7 = scmp.lt.u32.totalorder %s4156_s23, %s5532_s30 }
 0x613   : > { %p4158_p10 = pnand %p4157_p4, %p4464_p3 }
 0x614   : > { %p4163_p5 = por %p4162_p0, %p4161_p6 }
 0x615   : > { %p4159_p8 = pneg %p4158_p10 }
 0x616   : > { %p4165_p11 = por %p4164_p7, %p4163_p5 }
 0x618   : > { %p4166_p1 = pnand %p4165_p11, %p4159_p8 }
 0x61a   : > { %4169 = shalt.err (!%p4166_p1)
}
 0x61b   : > { %s4232_s11 = smov 64   ;;  %s4233_s13 = smov 4  }
 0x61c   : > { %3691 = dma.vmem_to_hbm [thread:$0]  (%p4464_p3), %s5527_s24, 256, %s5532_s30, %s3177_s22, %s4232_s11, %s4232_s11, %s4233_s13  }
 0x61d PF: > { %s5681_s21 = sld [smem:[#allocation17_spill]]  ;;  %s5682_s8 = sld [smem:[#allocation18_spill]] }
 0x61e   : > { %p3723_p2 = scmp.ge.s32.totalorder %s4220_s20, 2 }
 0x623   : > { %s3205_s28 = sand.u32 1, %s5681_s21   ;;  %p5683_p12 = scmp.ne.s32.totalorder %s5682_s8, 0 }
 0x624   : > { %s3206_s23 = scalar_lea.sflag [#allocation4], %s3205_s28 }
 0x625   : > { %p3711_p9 = pnand %p3723_p2, %p5683_p12 }
 0x627   : > { %4203 = dma.done.wait (!%p3711_p9), %s3206_s23, 256  }
 0x628   : > { %4205 = vsyncadd (!%p3711_p9), %s3206_s23, 4294967040  ;;  %s5684_s25 = smov %s4451_s17  ;;  %p26_p13 = scmp.ge.s32.totalorder %s4451_s17, 6  }
 0x629   : > { %s5685_s17 = smov %s4212_s18  ;;  %s5686_s18 = smov %s4216_s19 }
 0x62a   : > { %s5687_s19 = smov %s4460_s29  ;;  %s5688_s20 = smov %s5684_s25 }
 0x62b   :  { %28 = sbr.rel (!%p26_p13) target bundleno = 11 (0xb), region = 126 }
 0x632   :  { %3211 = vsyncpa [#allocation3], 1 }
 0x633   :  { %3213 = vsyncpa [#allocation3 + $0x1], 1 }
 0x634   :  { %3214 = vsyncpa [#allocation6], 1 }
 0x635   :  { %3216 = vsyncpa [#allocation6 + $0x1], 1 }
 0x636   :  { %3217 = vsyncpa [#allocation9], 1 }
 0x637   :  { %3218 = vsyncpa [#allocation4], 1 }
 0x638   :  { %3220 = vsyncpa [#allocation4 + $0x1], 1 }

</bundles_post_ra>
